<compile_context>
chip_gen: v6e
topology: v6e:2x2x1
jax: 0.10.0
libtpu: 0.0.40
codegen_flags: <defaults>
</compile_context>

<pallas_src>
import functools
import math

import jax
import jax.numpy as jnp
from jax import lax
from jax.experimental import pallas as pl
from jax.experimental.pallas import tpu as pltpu


# --------------------------------- helpers -----------------------------------
def _round_up(x, m):
    return ((x + m - 1) // m) * m


def _pick_t_tile(T, cap):
    for cand in range(min(cap, T), 0, -1):
        if T % cand == 0:
            return cand
    return T


# ------------------------------- fused kernel --------------------------------
def lstm_fused_kernel(*refs, num_layers, bs, t_tile):
    """Fused multi-layer LSTM + FC head over one (batch shard, time chunk).

    refs = (x_ref,
            [wih_l, whh_l, b_l] * num_layers,      # resident, bf16 / f32 bias
            fcw_ref, fcb_ref,                      # resident FC head
            logits_ref,                            # output (written last chunk)
            h_sc, c_sc,                            # [L, bs, Hp] f32 state carry
            seq_sc,                                # [rows, Hp] f32 inter-layer seq
            xproj_sc)                              # [rows, 4Hp] f32 hoisted proj
    Grid = (batch_shards, time_chunks); time axis is serial ("arbitrary").
    """
    x_ref = refs[0]
    layer_refs = [refs[1 + 3 * l: 4 + 3 * l] for l in range(num_layers)]
    fcw_ref = refs[1 + 3 * num_layers]
    fcb_ref = refs[2 + 3 * num_layers]
    logits_ref = refs[3 + 3 * num_layers]
    h_sc, c_sc, seq_sc, xproj_sc = refs[4 + 3 * num_layers:]

    Hp = h_sc.shape[-1]
    H3 = 3 * Hp
    t_idx = pl.program_id(1)

    @pl.when(t_idx == 0)
    def _init():
        h_sc[...] = jnp.zeros_like(h_sc)
        c_sc[...] = jnp.zeros_like(c_sc)

    for l, (wih_ref, whh_ref, b_ref) in enumerate(layer_refs):
        mm_dtype = whh_ref.dtype
        last_layer = (l == num_layers - 1)

        # Hoisted input projection (+ combined bias) for the whole chunk:
        # one big-M MXU matmul, result parked in VMEM scratch (bounded liveness).
        if l == 0:
            xin = x_ref[...]                       # already bf16 (cast in wrapper)
        else:
            xin = seq_sc[...].astype(mm_dtype)     # previous layer's chunk output
        xproj_sc[...] = (jnp.dot(xin, wih_ref[...],
                                 preferred_element_type=jnp.float32)
                         + b_ref[...])

        def step(t, carry):
            h, c = carry
            r0 = pl.multiple_of(t * bs, bs)        # sublane-aligned row offset
            gates = (xproj_sc[pl.ds(r0, bs), :]
                     + jnp.dot(h.astype(mm_dtype), whh_ref[...],
                               preferred_element_type=jnp.float32))
            # gate order i|f|o|g: one contiguous sigmoid slice + one tanh slice.
            sig = 0.5 * jnp.tanh(0.5 * gates[:, :H3]) + 0.5
            g_g = jnp.tanh(gates[:, H3:])
            i_g = sig[:, :Hp]
            f_g = sig[:, Hp:2 * Hp]
            o_g = sig[:, 2 * Hp:H3]
            c = f_g * c + i_g * g_g
            h = o_g * jnp.tanh(c)
            if not last_layer:                     # feed next layer (VMEM only)
                seq_sc[pl.ds(r0, bs), :] = h
            return (h, c)

        h_f, c_f = lax.fori_loop(0, t_tile, step, (h_sc[l], c_sc[l]), unroll=True)
        h_sc[l] = h_f
        c_sc[l] = c_f

    # Fused FC head: finalize phase of the last time chunk only.
    @pl.when(t_idx == pl.num_programs(1) - 1)
    def _fc():
        h_last = h_sc[num_layers - 1]
        logits_ref[...] = (jnp.dot(h_last.astype(fcw_ref.dtype), fcw_ref[...],
                                   preferred_element_type=jnp.float32)
                           + fcb_ref[...])


# ------------------------------ module forward --------------------------------
@functools.partial(jax.jit, static_argnames=("t_tile", "max_batch_shards"))
def lstm_classifier_forward(x_btd, kparams, *, t_tile=16, max_batch_shards=1):
    """x_btd: [B, T, D] batch_first f32 (like the PyTorch module).
    kparams: output of prepare_kernel_params. Returns logits [B, num_classes]."""
    B, T, D = x_btd.shape
    layers = kparams["layers"]
    L = len(layers)
    Hp = layers[0][1].shape[0]                     # whh: [Hp, 4Hp]
    C = kparams["fc_w"].shape[1]

    # Batch padding / optional batch sharding (set max_batch_shards=2 on v7x).
    bp = _round_up(B, 8)
    nb = 1
    if max_batch_shards > 1 and bp % max_batch_shards == 0 \
            and (bp // max_batch_shards) % 8 == 0:
        nb = max_batch_shards
    bs = bp // nb

    tt = _pick_t_tile(T, t_tile)
    n_chunks = T // tt
    rows = tt * bs

    # Layout: [nb, T, bs, D] flattened to 2-D rows so every (shard, chunk) is a
    # contiguous sublane-aligned row block.  Cast to bf16 -> half the DMA bytes.
    x = x_btd.astype(layers[0][0].dtype)
    if bp != B:
        x = jnp.pad(x, ((0, bp - B), (0, 0), (0, 0)))
    x = jnp.transpose(x, (1, 0, 2))                                  # [T, bp, D]
    x = x.reshape(T, nb, bs, D).transpose(1, 0, 2, 3).reshape(nb * T * bs, D)

    in_specs = [pl.BlockSpec((rows, D), lambda b, t: (b * n_chunks + t, 0))]
    args = [x]
    for (wih, whh, bias) in layers:                # weights stay VMEM-resident
        din = wih.shape[0]
        in_specs += [pl.BlockSpec((din, 4 * Hp), lambda b, t: (0, 0)),
                     pl.BlockSpec((Hp, 4 * Hp), lambda b, t: (0, 0)),
                     pl.BlockSpec((1, 4 * Hp), lambda b, t: (0, 0))]
        args += [wih, whh, bias]
    in_specs += [pl.BlockSpec((Hp, C), lambda b, t: (0, 0)),
                 pl.BlockSpec((1, C), lambda b, t: (0, 0))]
    args += [kparams["fc_w"], kparams["fc_b"]]

    # Explicit VMEM budget sized against the actual resident footprint
    # (weights double-buffered by the BlockSpec pipeline + chunk + scratch).
    def _nbytes(a):
        return a.size * a.dtype.itemsize
    weight_bytes = sum(_nbytes(a) for a in args[1:])
    scratch_bytes = (2 * L * bs * Hp + rows * Hp + rows * 4 * Hp) * 4
    est = (2 * weight_bytes + 2 * _nbytes(x) // (nb * n_chunks)
           + 2 * bs * C * 4 + scratch_bytes + (4 << 20))
    vmem_limit = int(min(100 * 1024 * 1024, max(32 * 1024 * 1024, est)))

    logits = pl.pallas_call(
        functools.partial(lstm_fused_kernel, num_layers=L, bs=bs, t_tile=tt),
        out_shape=jax.ShapeDtypeStruct((bp, C), jnp.float32),
        grid_spec=pltpu.PrefetchScalarGridSpec(
            num_scalar_prefetch=0,
            grid=(nb, n_chunks),
            in_specs=in_specs,
            out_specs=pl.BlockSpec((bs, C), lambda b, t: (b, 0)),
            scratch_shapes=[
                pltpu.VMEM((L, bs, Hp), jnp.float32),    # h state per layer
                pltpu.VMEM((L, bs, Hp), jnp.float32),    # c state per layer
                pltpu.VMEM((rows, Hp), jnp.float32),     # inter-layer chunk seq
                pltpu.VMEM((rows, 4 * Hp), jnp.float32),  # hoisted input proj
            ]),
        compiler_params=pltpu.CompilerParams(
            dimension_semantics=("parallel", "arbitrary"),
            vmem_limit_bytes=vmem_limit),
    )(*args)
    return logits[:B]


# --------------------------- parameter construction ---------------------------
def init_params(key, input_size, hidden_size, num_layers, num_classes):
    """f32 master weights in torch nn.LSTM layout/ordering (gates i|f|g|o),
    init U(-1/sqrt(H), 1/sqrt(H)) like PyTorch defaults."""
    bound = 1.0 / math.sqrt(hidden_size)
    layers = []
    for layer in range(num_layers):
        d_in = input_size if layer == 0 else hidden_size
        key, k1, k2, k3, k4 = jax.random.split(key, 5)
        w_ih = jax.random.uniform(k1, (4 * hidden_size, d_in), jnp.float32, -bound, bound)
        w_hh = jax.random.uniform(k2, (4 * hidden_size, hidden_size), jnp.float32, -bound, bound)
        b_ih = jax.random.uniform(k3, (4 * hidden_size,), jnp.float32, -bound, bound)
        b_hh = jax.random.uniform(k4, (4 * hidden_size,), jnp.float32, -bound, bound)
        layers.append((w_ih, w_hh, b_ih, b_hh))
    key, k5, k6 = jax.random.split(key, 3)
    fc_w = jax.random.uniform(k5, (num_classes, hidden_size), jnp.float32, -bound, bound)
    fc_b = jax.random.uniform(k6, (num_classes,), jnp.float32, -bound, bound)
    return {"lstm_layers": layers, "fc_w": fc_w, "fc_b": fc_b}


_GATE_PERM = (0, 1, 3, 2)    # torch i|f|g|o  ->  kernel i|f|o|g (sigmoids contiguous)


def _fuse_pad_weight(w, H, Hp, d_in, d_in_p, dtype):
    """torch [4H, d_in] -> fused gate-major [d_in_p, 4Hp], i|f|o|g, zero-padded."""
    w4 = w.reshape(4, H, d_in)
    w4 = jnp.stack([w4[g] for g in _GATE_PERM], axis=0)
    w4 = jnp.pad(w4, ((0, 0), (0, Hp - H), (0, d_in_p - d_in)))
    return jnp.transpose(w4, (2, 0, 1)).reshape(d_in_p, 4 * Hp).astype(dtype)


def _fuse_pad_bias(b_ih, b_hh, H, Hp):
    b = (b_ih + b_hh).reshape(4, H)
    b = jnp.stack([b[g] for g in _GATE_PERM], axis=0)
    b = jnp.pad(b, ((0, 0), (0, Hp - H)))
    return b.reshape(1, 4 * Hp).astype(jnp.float32)


def prepare_kernel_params(params, matmul_dtype=jnp.bfloat16, lane=128):
    """Fuse per-gate weights, pad hidden to a lane multiple (exact: padded lanes
    stay 0 through the recurrence), cast MXU operands to bf16 (biases f32)."""
    layers = params["lstm_layers"]
    H = layers[0][1].shape[1]
    Hp = _round_up(max(H, lane), lane)
    out_layers = []
    for li, (w_ih, w_hh, b_ih, b_hh) in enumerate(layers):
        d_in = w_ih.shape[1]
        d_in_p = d_in if li == 0 else Hp
        out_layers.append((
            _fuse_pad_weight(w_ih, H, Hp, d_in, d_in_p, matmul_dtype),
            _fuse_pad_weight(w_hh, H, Hp, H, Hp, matmul_dtype),
            _fuse_pad_bias(b_ih, b_hh, H, Hp)))
    C = params["fc_w"].shape[0]
    fc_w = jnp.pad(params["fc_w"].T, ((0, Hp - H), (0, 0))).astype(matmul_dtype)
    fc_b = params["fc_b"].reshape(1, C).astype(jnp.float32)
    return {"layers": out_layers, "fc_w": fc_w, "fc_b": fc_b}


# ------------------------------ references ------------------------------------
def reference_forward_f32(x_btd, params):
    """True f32 PyTorch-equivalent LSTM + FC (torch gate order, jax.nn.sigmoid)."""
    B = x_btd.shape[0]
    seq = jnp.transpose(x_btd, (1, 0, 2))           # [T, B, D]
    h_last = None
    hi = jax.lax.Precision.HIGHEST
    for (w_ih, w_hh, b_ih, b_hh) in params["lstm_layers"]:
        H = w_hh.shape[1]

        def step(carry, x_t, w_ih=w_ih, w_hh=w_hh, b_ih=b_ih, b_hh=b_hh, H=H):
            h, c = carry
            gates = (jnp.dot(x_t, w_ih.T, precision=hi) + b_ih
                     + jnp.dot(h, w_hh.T, precision=hi) + b_hh)
            i = jax.nn.sigmoid(gates[:, 0 * H:1 * H])
            f = jax.nn.sigmoid(gates[:, 1 * H:2 * H])
            g = jnp.tanh(gates[:, 2 * H:3 * H])
            o = jax.nn.sigmoid(gates[:, 3 * H:4 * H])
            c = f * c + i * g
            h = o * jnp.tanh(c)
            return (h, c), h

        init = (jnp.zeros((B, H), jnp.float32), jnp.zeros((B, H), jnp.float32))
        (h_last, _), seq = lax.scan(step, init, seq)
    return jnp.dot(h_last, params["fc_w"].T, precision=hi) + params["fc_b"]


def reference_forward_mirrored(x_btd, kparams):
    """Mirrors the kernel numerics (bf16 matmul operands, f32 accumulation,
    tanh-form sigmoid, padded hidden, i|f|o|g gate order)."""
    B = x_btd.shape[0]
    layers = kparams["layers"]
    Hp = layers[0][1].shape[0]
    seq = jnp.transpose(x_btd, (1, 0, 2)).astype(layers[0][0].dtype)
    h_last = None
    for (wih, whh, b) in layers:
        def step(carry, x_t, wih=wih, whh=whh, b=b):
            h, c = carry
            gates = (jnp.dot(x_t.astype(wih.dtype), wih,
                             preferred_element_type=jnp.float32) + b
                     + jnp.dot(h.astype(whh.dtype), whh,
                               preferred_element_type=jnp.float32))
            sig = 0.5 * jnp.tanh(0.5 * gates[:, :3 * Hp]) + 0.5
            g = jnp.tanh(gates[:, 3 * Hp:])
            c = sig[:, Hp:2 * Hp] * c + sig[:, :Hp] * g
            h = sig[:, 2 * Hp:] * jnp.tanh(c)
            return (h, c), h

        init = (jnp.zeros((B, Hp), jnp.float32), jnp.zeros((B, Hp), jnp.float32))
        (h_last, _), seq = lax.scan(step, init, seq)
    fc_w, fc_b = kparams["fc_w"], kparams["fc_b"]
    return jnp.dot(h_last.astype(fc_w.dtype), fc_w,
                   preferred_element_type=jnp.float32) + fc_b


# ----------------------------------- main --------------------------------------
if __name__ == "__main__":
    # Small shapes consistent with the module's forward: x is [B, T, D].
    B, T, D = 2, 8, 16
    H, L, C = 32, 2, 4

    key = jax.random.PRNGKey(0)
    key, kx = jax.random.split(key)
    x = jax.random.normal(kx, (B, T, D), jnp.float32)

    params = init_params(key, input_size=D, hidden_size=H,
                         num_layers=L, num_classes=C)
    kparams = prepare_kernel_params(params)

    logits = lstm_classifier_forward(x, kparams, t_tile=4)   # 2 time chunks
    logits = jax.block_until_ready(logits)
    assert logits.shape == (B, C)

    # Tight check: same-numerics reference (kernel math implemented correctly).
    ref_m = reference_forward_mirrored(x, kparams)
    err_m = float(jnp.max(jnp.abs(logits - ref_m)))
    assert jnp.allclose(logits, ref_m, atol=3e-3, rtol=3e-3), f"mirrored mismatch {err_m}"

    # Loose check: true f32 PyTorch-equivalent LSTM (bf16 operand drift bounded).
    ref_f = reference_forward_f32(x, params)
    err_f = float(jnp.max(jnp.abs(logits - ref_f)))
    assert jnp.allclose(logits, ref_f, atol=5e-2, rtol=5e-2), f"f32 mismatch {err_f}"

    print("KERNEL_OK")
</pallas_src>

<mosaic_0001>
module attributes {stable_mosaic.version = 11 : i64} {
  func.func @lstm_fused_kernel(%arg0: i32, %arg1: i32, %arg2: memref<32x16xbf16, #tpu.memory_space<vmem>>, %arg3: memref<16x512xbf16, #tpu.memory_space<vmem>>, %arg4: memref<128x512xbf16, #tpu.memory_space<vmem>>, %arg5: memref<1x512xf32, #tpu.memory_space<vmem>>, %arg6: memref<128x512xbf16, #tpu.memory_space<vmem>>, %arg7: memref<128x512xbf16, #tpu.memory_space<vmem>>, %arg8: memref<1x512xf32, #tpu.memory_space<vmem>>, %arg9: memref<128x4xbf16, #tpu.memory_space<vmem>>, %arg10: memref<1x4xf32, #tpu.memory_space<vmem>>, %arg11: memref<8x4xf32, #tpu.memory_space<vmem>>, %arg12: memref<2x8x128xf32, #tpu.memory_space<vmem>>, %arg13: memref<2x8x128xf32, #tpu.memory_space<vmem>>, %arg14: memref<32x128xf32, #tpu.memory_space<vmem>>, %arg15: memref<32x512xf32, #tpu.memory_space<vmem>>) attributes {dimension_semantics = [#tpu.dimension_semantics<parallel>, #tpu.dimension_semantics<arbitrary>], iteration_bounds = array<i64: 1, 2>, scalar_prefetch = 0 : i64, scratch_operands = 4 : i64, tpu.core_type = #tpu.core_type<tc>, window_params = [{transform_indices = @transform_0, window_bounds = array<i64: 32, 16>}, {pipeline_mode = #tpu.pipeline_mode<synchronous>, transform_indices = @transform_1, window_bounds = array<i64: 16, 512>}, {pipeline_mode = #tpu.pipeline_mode<synchronous>, transform_indices = @transform_2, window_bounds = array<i64: 128, 512>}, {pipeline_mode = #tpu.pipeline_mode<synchronous>, transform_indices = @transform_3, window_bounds = array<i64: 1, 512>}, {pipeline_mode = #tpu.pipeline_mode<synchronous>, transform_indices = @transform_4, window_bounds = array<i64: 128, 512>}, {pipeline_mode = #tpu.pipeline_mode<synchronous>, transform_indices = @transform_5, window_bounds = array<i64: 128, 512>}, {pipeline_mode = #tpu.pipeline_mode<synchronous>, transform_indices = @transform_6, window_bounds = array<i64: 1, 512>}, {pipeline_mode = #tpu.pipeline_mode<synchronous>, transform_indices = @transform_7, window_bounds = array<i64: 128, 4>}, {pipeline_mode = #tpu.pipeline_mode<synchronous>, transform_indices = @transform_8, window_bounds = array<i64: 1, 4>}, {transform_indices = @transform_9, window_bounds = array<i64: 8, 4>}]} {
    %c0_i32 = arith.constant 0 : i32
    %0 = arith.cmpi eq, %arg1, %c0_i32 : i32
    %1 = arith.extui %0 : i1 to i32
    %c0_i32_0 = arith.constant 0 : i32
    %2 = arith.cmpi ne, %1, %c0_i32_0 : i32
    scf.if %2 {
      %cst_115 = arith.constant 0.000000e+00 : f32
      %257 = vector.broadcast %cst_115 : f32 to vector<2x8x128xf32>
      %c0_116 = arith.constant 0 : index
      %c0_117 = arith.constant 0 : index
      %c0_118 = arith.constant 0 : index
      %258 = vector.load %arg12[%c0_116, %c0_117, %c0_118] : memref<2x8x128xf32, #tpu.memory_space<vmem>>, vector<2x8x128xf32>
      tpu.vector_store %arg12[%c0_116, %c0_117, %c0_118], %257 {strides = array<i32>} : memref<2x8x128xf32, #tpu.memory_space<vmem>>, vector<2x8x128xf32>,
      %cst_119 = arith.constant 0.000000e+00 : f32
      %259 = vector.broadcast %cst_119 : f32 to vector<2x8x128xf32>
      %c0_120 = arith.constant 0 : index
      %c0_121 = arith.constant 0 : index
      %c0_122 = arith.constant 0 : index
      %260 = vector.load %arg13[%c0_120, %c0_121, %c0_122] : memref<2x8x128xf32, #tpu.memory_space<vmem>>, vector<2x8x128xf32>
      tpu.vector_store %arg13[%c0_120, %c0_121, %c0_122], %259 {strides = array<i32>} : memref<2x8x128xf32, #tpu.memory_space<vmem>>, vector<2x8x128xf32>,
    } else {
    }
    %c0 = arith.constant 0 : index
    %c0_1 = arith.constant 0 : index
    %3 = vector.load %arg2[%c0, %c0_1] : memref<32x16xbf16, #tpu.memory_space<vmem>>, vector<32x16xbf16>
    %c0_2 = arith.constant 0 : index
    %c0_3 = arith.constant 0 : index
    %4 = vector.load %arg3[%c0_2, %c0_3] : memref<16x512xbf16, #tpu.memory_space<vmem>>, vector<16x512xbf16>
    %cst = arith.constant dense<0.000000e+00> : vector<32x512xf32>
    %5 = tpu.matmul %3, %4, %cst {dimension_numbers = #tpu.dot_dimension_numbers<[1], [0], [0], [1], [0, 0, 1, 1], [], []>} : vector<32x16xbf16>, vector<16x512xbf16>, vector<32x512xf32> -> vector<32x512xf32>
    %c0_4 = arith.constant 0 : index
    %c0_5 = arith.constant 0 : index
    %6 = vector.load %arg5[%c0_4, %c0_5] : memref<1x512xf32, #tpu.memory_space<vmem>>, vector<1x512xf32>
    %7 = vector.broadcast %6 : vector<1x512xf32> to vector<32x512xf32>
    %8 = arith.addf %5, %7 : vector<32x512xf32>
    %c0_6 = arith.constant 0 : index
    %c0_7 = arith.constant 0 : index
    %9 = vector.load %arg15[%c0_6, %c0_7] : memref<32x512xf32, #tpu.memory_space<vmem>>, vector<32x512xf32>
    tpu.vector_store %arg15[%c0_6, %c0_7], %8 {strides = array<i32>} : memref<32x512xf32, #tpu.memory_space<vmem>>, vector<32x512xf32>,
    %c0_8 = arith.constant 0 : index
    %c0_9 = arith.constant 0 : index
    %c0_10 = arith.constant 0 : index
    %10 = vector.load %arg12[%c0_8, %c0_9, %c0_10] : memref<2x8x128xf32, #tpu.memory_space<vmem>>, vector<1x8x128xf32>
    %11 = vector.shape_cast %10 : vector<1x8x128xf32> to vector<8x128xf32>
    %c0_11 = arith.constant 0 : index
    %c0_12 = arith.constant 0 : index
    %c0_13 = arith.constant 0 : index
    %12 = vector.load %arg13[%c0_11, %c0_12, %c0_13] : memref<2x8x128xf32, #tpu.memory_space<vmem>>, vector<1x8x128xf32>
    %13 = vector.shape_cast %12 : vector<1x8x128xf32> to vector<8x128xf32>
    %c0_i32_14 = arith.constant 0 : i32
    %c8_i32 = arith.constant 8 : i32
    %14 = arith.muli %c0_i32_14, %c8_i32 : i32
    %15 = tpu.assume_multiple %14, 8 : i32
    %16 = arith.index_cast %15 : i32 to index
    %c0_15 = arith.constant 0 : index
    %17 = vector.load %arg15[%16, %c0_15] : memref<32x512xf32, #tpu.memory_space<vmem>>, vector<8x512xf32>
    %18 = arith.truncf %11 : vector<8x128xf32> to vector<8x128xbf16>
    %c0_16 = arith.constant 0 : index
    %c0_17 = arith.constant 0 : index
    %19 = vector.load %arg4[%c0_16, %c0_17] : memref<128x512xbf16, #tpu.memory_space<vmem>>, vector<128x512xbf16>
    %cst_18 = arith.constant dense<0.000000e+00> : vector<8x512xf32>
    %20 = tpu.matmul %18, %19, %cst_18 {dimension_numbers = #tpu.dot_dimension_numbers<[1], [0], [0], [1], [0, 0, 1, 1], [], []>} : vector<8x128xbf16>, vector<128x512xbf16>, vector<8x512xf32> -> vector<8x512xf32>
    %21 = arith.addf %17, %20 : vector<8x512xf32>
    %22 = vector.extract_strided_slice %21 {offsets = [0, 0], sizes = [8, 384], strides = [1, 1]} : vector<8x512xf32> to vector<8x384xf32>
    %cst_19 = arith.constant 5.000000e-01 : f32
    %23 = vector.broadcast %cst_19 : f32 to vector<8x384xf32>
    %24 = arith.mulf %23, %22 : vector<8x384xf32>
    %25 = math.tanh %24 : vector<8x384xf32>
    %cst_20 = arith.constant 5.000000e-01 : f32
    %26 = vector.broadcast %cst_20 : f32 to vector<8x384xf32>
    %27 = arith.mulf %26, %25 : vector<8x384xf32>
    %cst_21 = arith.constant 5.000000e-01 : f32
    %28 = vector.broadcast %cst_21 : f32 to vector<8x384xf32>
    %29 = arith.addf %27, %28 : vector<8x384xf32>
    %30 = vector.extract_strided_slice %21 {offsets = [0, 384], sizes = [8, 128], strides = [1, 1]} : vector<8x512xf32> to vector<8x128xf32>
    %31 = math.tanh %30 : vector<8x128xf32>
    %32 = vector.extract_strided_slice %29 {offsets = [0, 0], sizes = [8, 128], strides = [1, 1]} : vector<8x384xf32> to vector<8x128xf32>
    %33 = vector.extract_strided_slice %29 {offsets = [0, 128], sizes = [8, 128], strides = [1, 1]} : vector<8x384xf32> to vector<8x128xf32>
    %34 = vector.extract_strided_slice %29 {offsets = [0, 256], sizes = [8, 128], strides = [1, 1]} : vector<8x384xf32> to vector<8x128xf32>
    %35 = arith.mulf %33, %13 : vector<8x128xf32>
    %36 = arith.mulf %32, %31 : vector<8x128xf32>
    %37 = arith.addf %35, %36 : vector<8x128xf32>
    %38 = math.tanh %37 : vector<8x128xf32>
    %39 = arith.mulf %34, %38 : vector<8x128xf32>
    %40 = arith.index_cast %15 : i32 to index
    %c0_22 = arith.constant 0 : index
    %41 = vector.load %arg14[%40, %c0_22] : memref<32x128xf32, #tpu.memory_space<vmem>>, vector<8x128xf32>
    tpu.vector_store %arg14[%40, %c0_22], %39 {strides = array<i32>} : memref<32x128xf32, #tpu.memory_space<vmem>>, vector<8x128xf32>,
    %c1_i32 = arith.constant 1 : i32
    %c8_i32_23 = arith.constant 8 : i32
    %42 = arith.muli %c1_i32, %c8_i32_23 : i32
    %43 = tpu.assume_multiple %42, 8 : i32
    %44 = arith.index_cast %43 : i32 to index
    %c0_24 = arith.constant 0 : index
    %45 = vector.load %arg15[%44, %c0_24] : memref<32x512xf32, #tpu.memory_space<vmem>>, vector<8x512xf32>
    %46 = arith.truncf %39 : vector<8x128xf32> to vector<8x128xbf16>
    %c0_25 = arith.constant 0 : index
    %c0_26 = arith.constant 0 : index
    %47 = vector.load %arg4[%c0_25, %c0_26] : memref<128x512xbf16, #tpu.memory_space<vmem>>, vector<128x512xbf16>
    %cst_27 = arith.constant dense<0.000000e+00> : vector<8x512xf32>
    %48 = tpu.matmul %46, %47, %cst_27 {dimension_numbers = #tpu.dot_dimension_numbers<[1], [0], [0], [1], [0, 0, 1, 1], [], []>} : vector<8x128xbf16>, vector<128x512xbf16>, vector<8x512xf32> -> vector<8x512xf32>
    %49 = arith.addf %45, %48 : vector<8x512xf32>
    %50 = vector.extract_strided_slice %49 {offsets = [0, 0], sizes = [8, 384], strides = [1, 1]} : vector<8x512xf32> to vector<8x384xf32>
    %cst_28 = arith.constant 5.000000e-01 : f32
    %51 = vector.broadcast %cst_28 : f32 to vector<8x384xf32>
    %52 = arith.mulf %51, %50 : vector<8x384xf32>
    %53 = math.tanh %52 : vector<8x384xf32>
    %cst_29 = arith.constant 5.000000e-01 : f32
    %54 = vector.broadcast %cst_29 : f32 to vector<8x384xf32>
    %55 = arith.mulf %54, %53 : vector<8x384xf32>
    %cst_30 = arith.constant 5.000000e-01 : f32
    %56 = vector.broadcast %cst_30 : f32 to vector<8x384xf32>
    %57 = arith.addf %55, %56 : vector<8x384xf32>
    %58 = vector.extract_strided_slice %49 {offsets = [0, 384], sizes = [8, 128], strides = [1, 1]} : vector<8x512xf32> to vector<8x128xf32>
    %59 = math.tanh %58 : vector<8x128xf32>
    %60 = vector.extract_strided_slice %57 {offsets = [0, 0], sizes = [8, 128], strides = [1, 1]} : vector<8x384xf32> to vector<8x128xf32>
    %61 = vector.extract_strided_slice %57 {offsets = [0, 128], sizes = [8, 128], strides = [1, 1]} : vector<8x384xf32> to vector<8x128xf32>
    %62 = vector.extract_strided_slice %57 {offsets = [0, 256], sizes = [8, 128], strides = [1, 1]} : vector<8x384xf32> to vector<8x128xf32>
    %63 = arith.mulf %61, %37 : vector<8x128xf32>
    %64 = arith.mulf %60, %59 : vector<8x128xf32>
    %65 = arith.addf %63, %64 : vector<8x128xf32>
    %66 = math.tanh %65 : vector<8x128xf32>
    %67 = arith.mulf %62, %66 : vector<8x128xf32>
    %68 = arith.index_cast %43 : i32 to index
    %c0_31 = arith.constant 0 : index
    %69 = vector.load %arg14[%68, %c0_31] : memref<32x128xf32, #tpu.memory_space<vmem>>, vector<8x128xf32>
    tpu.vector_store %arg14[%68, %c0_31], %67 {strides = array<i32>} : memref<32x128xf32, #tpu.memory_space<vmem>>, vector<8x128xf32>,
    %c2_i32 = arith.constant 2 : i32
    %c8_i32_32 = arith.constant 8 : i32
    %70 = arith.muli %c2_i32, %c8_i32_32 : i32
    %71 = tpu.assume_multiple %70, 8 : i32
    %72 = arith.index_cast %71 : i32 to index
    %c0_33 = arith.constant 0 : index
    %73 = vector.load %arg15[%72, %c0_33] : memref<32x512xf32, #tpu.memory_space<vmem>>, vector<8x512xf32>
    %74 = arith.truncf %67 : vector<8x128xf32> to vector<8x128xbf16>
    %c0_34 = arith.constant 0 : index
    %c0_35 = arith.constant 0 : index
    %75 = vector.load %arg4[%c0_34, %c0_35] : memref<128x512xbf16, #tpu.memory_space<vmem>>, vector<128x512xbf16>
    %cst_36 = arith.constant dense<0.000000e+00> : vector<8x512xf32>
    %76 = tpu.matmul %74, %75, %cst_36 {dimension_numbers = #tpu.dot_dimension_numbers<[1], [0], [0], [1], [0, 0, 1, 1], [], []>} : vector<8x128xbf16>, vector<128x512xbf16>, vector<8x512xf32> -> vector<8x512xf32>
    %77 = arith.addf %73, %76 : vector<8x512xf32>
    %78 = vector.extract_strided_slice %77 {offsets = [0, 0], sizes = [8, 384], strides = [1, 1]} : vector<8x512xf32> to vector<8x384xf32>
    %cst_37 = arith.constant 5.000000e-01 : f32
    %79 = vector.broadcast %cst_37 : f32 to vector<8x384xf32>
    %80 = arith.mulf %79, %78 : vector<8x384xf32>
    %81 = math.tanh %80 : vector<8x384xf32>
    %cst_38 = arith.constant 5.000000e-01 : f32
    %82 = vector.broadcast %cst_38 : f32 to vector<8x384xf32>
    %83 = arith.mulf %82, %81 : vector<8x384xf32>
    %cst_39 = arith.constant 5.000000e-01 : f32
    %84 = vector.broadcast %cst_39 : f32 to vector<8x384xf32>
    %85 = arith.addf %83, %84 : vector<8x384xf32>
    %86 = vector.extract_strided_slice %77 {offsets = [0, 384], sizes = [8, 128], strides = [1, 1]} : vector<8x512xf32> to vector<8x128xf32>
    %87 = math.tanh %86 : vector<8x128xf32>
    %88 = vector.extract_strided_slice %85 {offsets = [0, 0], sizes = [8, 128], strides = [1, 1]} : vector<8x384xf32> to vector<8x128xf32>
    %89 = vector.extract_strided_slice %85 {offsets = [0, 128], sizes = [8, 128], strides = [1, 1]} : vector<8x384xf32> to vector<8x128xf32>
    %90 = vector.extract_strided_slice %85 {offsets = [0, 256], sizes = [8, 128], strides = [1, 1]} : vector<8x384xf32> to vector<8x128xf32>
    %91 = arith.mulf %89, %65 : vector<8x128xf32>
    %92 = arith.mulf %88, %87 : vector<8x128xf32>
    %93 = arith.addf %91, %92 : vector<8x128xf32>
    %94 = math.tanh %93 : vector<8x128xf32>
    %95 = arith.mulf %90, %94 : vector<8x128xf32>
    %96 = arith.index_cast %71 : i32 to index
    %c0_40 = arith.constant 0 : index
    %97 = vector.load %arg14[%96, %c0_40] : memref<32x128xf32, #tpu.memory_space<vmem>>, vector<8x128xf32>
    tpu.vector_store %arg14[%96, %c0_40], %95 {strides = array<i32>} : memref<32x128xf32, #tpu.memory_space<vmem>>, vector<8x128xf32>,
    %c3_i32 = arith.constant 3 : i32
    %c8_i32_41 = arith.constant 8 : i32
    %98 = arith.muli %c3_i32, %c8_i32_41 : i32
    %99 = tpu.assume_multiple %98, 8 : i32
    %100 = arith.index_cast %99 : i32 to index
    %c0_42 = arith.constant 0 : index
    %101 = vector.load %arg15[%100, %c0_42] : memref<32x512xf32, #tpu.memory_space<vmem>>, vector<8x512xf32>
    %102 = arith.truncf %95 : vector<8x128xf32> to vector<8x128xbf16>
    %c0_43 = arith.constant 0 : index
    %c0_44 = arith.constant 0 : index
    %103 = vector.load %arg4[%c0_43, %c0_44] : memref<128x512xbf16, #tpu.memory_space<vmem>>, vector<128x512xbf16>
    %cst_45 = arith.constant dense<0.000000e+00> : vector<8x512xf32>
    %104 = tpu.matmul %102, %103, %cst_45 {dimension_numbers = #tpu.dot_dimension_numbers<[1], [0], [0], [1], [0, 0, 1, 1], [], []>} : vector<8x128xbf16>, vector<128x512xbf16>, vector<8x512xf32> -> vector<8x512xf32>
    %105 = arith.addf %101, %104 : vector<8x512xf32>
    %106 = vector.extract_strided_slice %105 {offsets = [0, 0], sizes = [8, 384], strides = [1, 1]} : vector<8x512xf32> to vector<8x384xf32>
    %cst_46 = arith.constant 5.000000e-01 : f32
    %107 = vector.broadcast %cst_46 : f32 to vector<8x384xf32>
    %108 = arith.mulf %107, %106 : vector<8x384xf32>
    %109 = math.tanh %108 : vector<8x384xf32>
    %cst_47 = arith.constant 5.000000e-01 : f32
    %110 = vector.broadcast %cst_47 : f32 to vector<8x384xf32>
    %111 = arith.mulf %110, %109 : vector<8x384xf32>
    %cst_48 = arith.constant 5.000000e-01 : f32
    %112 = vector.broadcast %cst_48 : f32 to vector<8x384xf32>
    %113 = arith.addf %111, %112 : vector<8x384xf32>
    %114 = vector.extract_strided_slice %105 {offsets = [0, 384], sizes = [8, 128], strides = [1, 1]} : vector<8x512xf32> to vector<8x128xf32>
    %115 = math.tanh %114 : vector<8x128xf32>
    %116 = vector.extract_strided_slice %113 {offsets = [0, 0], sizes = [8, 128], strides = [1, 1]} : vector<8x384xf32> to vector<8x128xf32>
    %117 = vector.extract_strided_slice %113 {offsets = [0, 128], sizes = [8, 128], strides = [1, 1]} : vector<8x384xf32> to vector<8x128xf32>
    %118 = vector.extract_strided_slice %113 {offsets = [0, 256], sizes = [8, 128], strides = [1, 1]} : vector<8x384xf32> to vector<8x128xf32>
    %119 = arith.mulf %117, %93 : vector<8x128xf32>
    %120 = arith.mulf %116, %115 : vector<8x128xf32>
    %121 = arith.addf %119, %120 : vector<8x128xf32>
    %122 = math.tanh %121 : vector<8x128xf32>
    %123 = arith.mulf %118, %122 : vector<8x128xf32>
    %124 = arith.index_cast %99 : i32 to index
    %c0_49 = arith.constant 0 : index
    %125 = vector.load %arg14[%124, %c0_49] : memref<32x128xf32, #tpu.memory_space<vmem>>, vector<8x128xf32>
    tpu.vector_store %arg14[%124, %c0_49], %123 {strides = array<i32>} : memref<32x128xf32, #tpu.memory_space<vmem>>, vector<8x128xf32>,
    %c4_i32 = arith.constant 4 : i32
    %c0_50 = arith.constant 0 : index
    %c0_51 = arith.constant 0 : index
    %c0_52 = arith.constant 0 : index
    %126 = vector.load %arg12[%c0_50, %c0_51, %c0_52] : memref<2x8x128xf32, #tpu.memory_space<vmem>>, vector<1x8x128xf32>
    %127 = vector.shape_cast %126 : vector<1x8x128xf32> to vector<8x128xf32>
    %128 = vector.shape_cast %123 : vector<8x128xf32> to vector<1x8x128xf32>
    tpu.vector_store %arg12[%c0_50, %c0_51, %c0_52], %128 {strides = array<i32>} : memref<2x8x128xf32, #tpu.memory_space<vmem>>, vector<1x8x128xf32>,
    %c0_53 = arith.constant 0 : index
    %c0_54 = arith.constant 0 : index
    %c0_55 = arith.constant 0 : index
    %129 = vector.load %arg13[%c0_53, %c0_54, %c0_55] : memref<2x8x128xf32, #tpu.memory_space<vmem>>, vector<1x8x128xf32>
    %130 = vector.shape_cast %129 : vector<1x8x128xf32> to vector<8x128xf32>
    %131 = vector.shape_cast %121 : vector<8x128xf32> to vector<1x8x128xf32>
    tpu.vector_store %arg13[%c0_53, %c0_54, %c0_55], %131 {strides = array<i32>} : memref<2x8x128xf32, #tpu.memory_space<vmem>>, vector<1x8x128xf32>,
    %c0_56 = arith.constant 0 : index
    %c0_57 = arith.constant 0 : index
    %132 = vector.load %arg14[%c0_56, %c0_57] : memref<32x128xf32, #tpu.memory_space<vmem>>, vector<32x128xf32>
    %133 = arith.truncf %132 : vector<32x128xf32> to vector<32x128xbf16>
    %c0_58 = arith.constant 0 : index
    %c0_59 = arith.constant 0 : index
    %134 = vector.load %arg6[%c0_58, %c0_59] : memref<128x512xbf16, #tpu.memory_space<vmem>>, vector<128x512xbf16>
    %cst_60 = arith.constant dense<0.000000e+00> : vector<32x512xf32>
    %135 = tpu.matmul %133, %134, %cst_60 {dimension_numbers = #tpu.dot_dimension_numbers<[1], [0], [0], [1], [0, 0, 1, 1], [], []>} : vector<32x128xbf16>, vector<128x512xbf16>, vector<32x512xf32> -> vector<32x512xf32>
    %c0_61 = arith.constant 0 : index
    %c0_62 = arith.constant 0 : index
    %136 = vector.load %arg8[%c0_61, %c0_62] : memref<1x512xf32, #tpu.memory_space<vmem>>, vector<1x512xf32>
    %137 = vector.broadcast %136 : vector<1x512xf32> to vector<32x512xf32>
    %138 = arith.addf %135, %137 : vector<32x512xf32>
    %c0_63 = arith.constant 0 : index
    %c0_64 = arith.constant 0 : index
    %139 = vector.load %arg15[%c0_63, %c0_64] : memref<32x512xf32, #tpu.memory_space<vmem>>, vector<32x512xf32>
    tpu.vector_store %arg15[%c0_63, %c0_64], %138 {strides = array<i32>} : memref<32x512xf32, #tpu.memory_space<vmem>>, vector<32x512xf32>,
    %c1 = arith.constant 1 : index
    %c0_65 = arith.constant 0 : index
    %c0_66 = arith.constant 0 : index
    %140 = vector.load %arg12[%c1, %c0_65, %c0_66] : memref<2x8x128xf32, #tpu.memory_space<vmem>>, vector<1x8x128xf32>
    %141 = vector.shape_cast %140 : vector<1x8x128xf32> to vector<8x128xf32>
    %c1_67 = arith.constant 1 : index
    %c0_68 = arith.constant 0 : index
    %c0_69 = arith.constant 0 : index
    %142 = vector.load %arg13[%c1_67, %c0_68, %c0_69] : memref<2x8x128xf32, #tpu.memory_space<vmem>>, vector<1x8x128xf32>
    %143 = vector.shape_cast %142 : vector<1x8x128xf32> to vector<8x128xf32>
    %c0_i32_70 = arith.constant 0 : i32
    %c8_i32_71 = arith.constant 8 : i32
    %144 = arith.muli %c0_i32_70, %c8_i32_71 : i32
    %145 = tpu.assume_multiple %144, 8 : i32
    %146 = arith.index_cast %145 : i32 to index
    %c0_72 = arith.constant 0 : index
    %147 = vector.load %arg15[%146, %c0_72] : memref<32x512xf32, #tpu.memory_space<vmem>>, vector<8x512xf32>
    %148 = arith.truncf %141 : vector<8x128xf32> to vector<8x128xbf16>
    %c0_73 = arith.constant 0 : index
    %c0_74 = arith.constant 0 : index
    %149 = vector.load %arg7[%c0_73, %c0_74] : memref<128x512xbf16, #tpu.memory_space<vmem>>, vector<128x512xbf16>
    %cst_75 = arith.constant dense<0.000000e+00> : vector<8x512xf32>
    %150 = tpu.matmul %148, %149, %cst_75 {dimension_numbers = #tpu.dot_dimension_numbers<[1], [0], [0], [1], [0, 0, 1, 1], [], []>} : vector<8x128xbf16>, vector<128x512xbf16>, vector<8x512xf32> -> vector<8x512xf32>
    %151 = arith.addf %147, %150 : vector<8x512xf32>
    %152 = vector.extract_strided_slice %151 {offsets = [0, 0], sizes = [8, 384], strides = [1, 1]} : vector<8x512xf32> to vector<8x384xf32>
    %cst_76 = arith.constant 5.000000e-01 : f32
    %153 = vector.broadcast %cst_76 : f32 to vector<8x384xf32>
    %154 = arith.mulf %153, %152 : vector<8x384xf32>
    %155 = math.tanh %154 : vector<8x384xf32>
    %cst_77 = arith.constant 5.000000e-01 : f32
    %156 = vector.broadcast %cst_77 : f32 to vector<8x384xf32>
    %157 = arith.mulf %156, %155 : vector<8x384xf32>
    %cst_78 = arith.constant 5.000000e-01 : f32
    %158 = vector.broadcast %cst_78 : f32 to vector<8x384xf32>
    %159 = arith.addf %157, %158 : vector<8x384xf32>
    %160 = vector.extract_strided_slice %151 {offsets = [0, 384], sizes = [8, 128], strides = [1, 1]} : vector<8x512xf32> to vector<8x128xf32>
    %161 = math.tanh %160 : vector<8x128xf32>
    %162 = vector.extract_strided_slice %159 {offsets = [0, 0], sizes = [8, 128], strides = [1, 1]} : vector<8x384xf32> to vector<8x128xf32>
    %163 = vector.extract_strided_slice %159 {offsets = [0, 128], sizes = [8, 128], strides = [1, 1]} : vector<8x384xf32> to vector<8x128xf32>
    %164 = vector.extract_strided_slice %159 {offsets = [0, 256], sizes = [8, 128], strides = [1, 1]} : vector<8x384xf32> to vector<8x128xf32>
    %165 = arith.mulf %163, %143 : vector<8x128xf32>
    %166 = arith.mulf %162, %161 : vector<8x128xf32>
    %167 = arith.addf %165, %166 : vector<8x128xf32>
    %168 = math.tanh %167 : vector<8x128xf32>
    %169 = arith.mulf %164, %168 : vector<8x128xf32>
    %c1_i32_79 = arith.constant 1 : i32
    %c8_i32_80 = arith.constant 8 : i32
    %170 = arith.muli %c1_i32_79, %c8_i32_80 : i32
    %171 = tpu.assume_multiple %170, 8 : i32
    %172 = arith.index_cast %171 : i32 to index
    %c0_81 = arith.constant 0 : index
    %173 = vector.load %arg15[%172, %c0_81] : memref<32x512xf32, #tpu.memory_space<vmem>>, vector<8x512xf32>
    %174 = arith.truncf %169 : vector<8x128xf32> to vector<8x128xbf16>
    %c0_82 = arith.constant 0 : index
    %c0_83 = arith.constant 0 : index
    %175 = vector.load %arg7[%c0_82, %c0_83] : memref<128x512xbf16, #tpu.memory_space<vmem>>, vector<128x512xbf16>
    %cst_84 = arith.constant dense<0.000000e+00> : vector<8x512xf32>
    %176 = tpu.matmul %174, %175, %cst_84 {dimension_numbers = #tpu.dot_dimension_numbers<[1], [0], [0], [1], [0, 0, 1, 1], [], []>} : vector<8x128xbf16>, vector<128x512xbf16>, vector<8x512xf32> -> vector<8x512xf32>
    %177 = arith.addf %173, %176 : vector<8x512xf32>
    %178 = vector.extract_strided_slice %177 {offsets = [0, 0], sizes = [8, 384], strides = [1, 1]} : vector<8x512xf32> to vector<8x384xf32>
    %cst_85 = arith.constant 5.000000e-01 : f32
    %179 = vector.broadcast %cst_85 : f32 to vector<8x384xf32>
    %180 = arith.mulf %179, %178 : vector<8x384xf32>
    %181 = math.tanh %180 : vector<8x384xf32>
    %cst_86 = arith.constant 5.000000e-01 : f32
    %182 = vector.broadcast %cst_86 : f32 to vector<8x384xf32>
    %183 = arith.mulf %182, %181 : vector<8x384xf32>
    %cst_87 = arith.constant 5.000000e-01 : f32
    %184 = vector.broadcast %cst_87 : f32 to vector<8x384xf32>
    %185 = arith.addf %183, %184 : vector<8x384xf32>
    %186 = vector.extract_strided_slice %177 {offsets = [0, 384], sizes = [8, 128], strides = [1, 1]} : vector<8x512xf32> to vector<8x128xf32>
    %187 = math.tanh %186 : vector<8x128xf32>
    %188 = vector.extract_strided_slice %185 {offsets = [0, 0], sizes = [8, 128], strides = [1, 1]} : vector<8x384xf32> to vector<8x128xf32>
    %189 = vector.extract_strided_slice %185 {offsets = [0, 128], sizes = [8, 128], strides = [1, 1]} : vector<8x384xf32> to vector<8x128xf32>
    %190 = vector.extract_strided_slice %185 {offsets = [0, 256], sizes = [8, 128], strides = [1, 1]} : vector<8x384xf32> to vector<8x128xf32>
    %191 = arith.mulf %189, %167 : vector<8x128xf32>
    %192 = arith.mulf %188, %187 : vector<8x128xf32>
    %193 = arith.addf %191, %192 : vector<8x128xf32>
    %194 = math.tanh %193 : vector<8x128xf32>
    %195 = arith.mulf %190, %194 : vector<8x128xf32>
    %c2_i32_88 = arith.constant 2 : i32
    %c8_i32_89 = arith.constant 8 : i32
    %196 = arith.muli %c2_i32_88, %c8_i32_89 : i32
    %197 = tpu.assume_multiple %196, 8 : i32
    %198 = arith.index_cast %197 : i32 to index
    %c0_90 = arith.constant 0 : index
    %199 = vector.load %arg15[%198, %c0_90] : memref<32x512xf32, #tpu.memory_space<vmem>>, vector<8x512xf32>
    %200 = arith.truncf %195 : vector<8x128xf32> to vector<8x128xbf16>
    %c0_91 = arith.constant 0 : index
    %c0_92 = arith.constant 0 : index
    %201 = vector.load %arg7[%c0_91, %c0_92] : memref<128x512xbf16, #tpu.memory_space<vmem>>, vector<128x512xbf16>
    %cst_93 = arith.constant dense<0.000000e+00> : vector<8x512xf32>
    %202 = tpu.matmul %200, %201, %cst_93 {dimension_numbers = #tpu.dot_dimension_numbers<[1], [0], [0], [1], [0, 0, 1, 1], [], []>} : vector<8x128xbf16>, vector<128x512xbf16>, vector<8x512xf32> -> vector<8x512xf32>
    %203 = arith.addf %199, %202 : vector<8x512xf32>
    %204 = vector.extract_strided_slice %203 {offsets = [0, 0], sizes = [8, 384], strides = [1, 1]} : vector<8x512xf32> to vector<8x384xf32>
    %cst_94 = arith.constant 5.000000e-01 : f32
    %205 = vector.broadcast %cst_94 : f32 to vector<8x384xf32>
    %206 = arith.mulf %205, %204 : vector<8x384xf32>
    %207 = math.tanh %206 : vector<8x384xf32>
    %cst_95 = arith.constant 5.000000e-01 : f32
    %208 = vector.broadcast %cst_95 : f32 to vector<8x384xf32>
    %209 = arith.mulf %208, %207 : vector<8x384xf32>
    %cst_96 = arith.constant 5.000000e-01 : f32
    %210 = vector.broadcast %cst_96 : f32 to vector<8x384xf32>
    %211 = arith.addf %209, %210 : vector<8x384xf32>
    %212 = vector.extract_strided_slice %203 {offsets = [0, 384], sizes = [8, 128], strides = [1, 1]} : vector<8x512xf32> to vector<8x128xf32>
    %213 = math.tanh %212 : vector<8x128xf32>
    %214 = vector.extract_strided_slice %211 {offsets = [0, 0], sizes = [8, 128], strides = [1, 1]} : vector<8x384xf32> to vector<8x128xf32>
    %215 = vector.extract_strided_slice %211 {offsets = [0, 128], sizes = [8, 128], strides = [1, 1]} : vector<8x384xf32> to vector<8x128xf32>
    %216 = vector.extract_strided_slice %211 {offsets = [0, 256], sizes = [8, 128], strides = [1, 1]} : vector<8x384xf32> to vector<8x128xf32>
    %217 = arith.mulf %215, %193 : vector<8x128xf32>
    %218 = arith.mulf %214, %213 : vector<8x128xf32>
    %219 = arith.addf %217, %218 : vector<8x128xf32>
    %220 = math.tanh %219 : vector<8x128xf32>
    %221 = arith.mulf %216, %220 : vector<8x128xf32>
    %c3_i32_97 = arith.constant 3 : i32
    %c8_i32_98 = arith.constant 8 : i32
    %222 = arith.muli %c3_i32_97, %c8_i32_98 : i32
    %223 = tpu.assume_multiple %222, 8 : i32
    %224 = arith.index_cast %223 : i32 to index
    %c0_99 = arith.constant 0 : index
    %225 = vector.load %arg15[%224, %c0_99] : memref<32x512xf32, #tpu.memory_space<vmem>>, vector<8x512xf32>
    %226 = arith.truncf %221 : vector<8x128xf32> to vector<8x128xbf16>
    %c0_100 = arith.constant 0 : index
    %c0_101 = arith.constant 0 : index
    %227 = vector.load %arg7[%c0_100, %c0_101] : memref<128x512xbf16, #tpu.memory_space<vmem>>, vector<128x512xbf16>
    %cst_102 = arith.constant dense<0.000000e+00> : vector<8x512xf32>
    %228 = tpu.matmul %226, %227, %cst_102 {dimension_numbers = #tpu.dot_dimension_numbers<[1], [0], [0], [1], [0, 0, 1, 1], [], []>} : vector<8x128xbf16>, vector<128x512xbf16>, vector<8x512xf32> -> vector<8x512xf32>
    %229 = arith.addf %225, %228 : vector<8x512xf32>
    %230 = vector.extract_strided_slice %229 {offsets = [0, 0], sizes = [8, 384], strides = [1, 1]} : vector<8x512xf32> to vector<8x384xf32>
    %cst_103 = arith.constant 5.000000e-01 : f32
    %231 = vector.broadcast %cst_103 : f32 to vector<8x384xf32>
    %232 = arith.mulf %231, %230 : vector<8x384xf32>
    %233 = math.tanh %232 : vector<8x384xf32>
    %cst_104 = arith.constant 5.000000e-01 : f32
    %234 = vector.broadcast %cst_104 : f32 to vector<8x384xf32>
    %235 = arith.mulf %234, %233 : vector<8x384xf32>
    %cst_105 = arith.constant 5.000000e-01 : f32
    %236 = vector.broadcast %cst_105 : f32 to vector<8x384xf32>
    %237 = arith.addf %235, %236 : vector<8x384xf32>
    %238 = vector.extract_strided_slice %229 {offsets = [0, 384], sizes = [8, 128], strides = [1, 1]} : vector<8x512xf32> to vector<8x128xf32>
    %239 = math.tanh %238 : vector<8x128xf32>
    %240 = vector.extract_strided_slice %237 {offsets = [0, 0], sizes = [8, 128], strides = [1, 1]} : vector<8x384xf32> to vector<8x128xf32>
    %241 = vector.extract_strided_slice %237 {offsets = [0, 128], sizes = [8, 128], strides = [1, 1]} : vector<8x384xf32> to vector<8x128xf32>
    %242 = vector.extract_strided_slice %237 {offsets = [0, 256], sizes = [8, 128], strides = [1, 1]} : vector<8x384xf32> to vector<8x128xf32>
    %243 = arith.mulf %241, %219 : vector<8x128xf32>
    %244 = arith.mulf %240, %239 : vector<8x128xf32>
    %245 = arith.addf %243, %244 : vector<8x128xf32>
    %246 = math.tanh %245 : vector<8x128xf32>
    %247 = arith.mulf %242, %246 : vector<8x128xf32>
    %c4_i32_106 = arith.constant 4 : i32
    %c1_107 = arith.constant 1 : index
    %c0_108 = arith.constant 0 : index
    %c0_109 = arith.constant 0 : index
    %248 = vector.load %arg12[%c1_107, %c0_108, %c0_109] : memref<2x8x128xf32, #tpu.memory_space<vmem>>, vector<1x8x128xf32>
    %249 = vector.shape_cast %248 : vector<1x8x128xf32> to vector<8x128xf32>
    %250 = vector.shape_cast %247 : vector<8x128xf32> to vector<1x8x128xf32>
    tpu.vector_store %arg12[%c1_107, %c0_108, %c0_109], %250 {strides = array<i32>} : memref<2x8x128xf32, #tpu.memory_space<vmem>>, vector<1x8x128xf32>,
    %c1_110 = arith.constant 1 : index
    %c0_111 = arith.constant 0 : index
    %c0_112 = arith.constant 0 : index
    %251 = vector.load %arg13[%c1_110, %c0_111, %c0_112] : memref<2x8x128xf32, #tpu.memory_space<vmem>>, vector<1x8x128xf32>
    %252 = vector.shape_cast %251 : vector<1x8x128xf32> to vector<8x128xf32>
    %253 = vector.shape_cast %245 : vector<8x128xf32> to vector<1x8x128xf32>
    tpu.vector_store %arg13[%c1_110, %c0_111, %c0_112], %253 {strides = array<i32>} : memref<2x8x128xf32, #tpu.memory_space<vmem>>, vector<1x8x128xf32>,
    %c1_i32_113 = arith.constant 1 : i32
    %254 = arith.cmpi eq, %arg1, %c1_i32_113 : i32
    %255 = arith.extui %254 : i1 to i32
    %c0_i32_114 = arith.constant 0 : i32
    %256 = arith.cmpi ne, %255, %c0_i32_114 : i32
    scf.if %256 {
      %c1_115 = arith.constant 1 : index
      %c0_116 = arith.constant 0 : index
      %c0_117 = arith.constant 0 : index
      %257 = vector.load %arg12[%c1_115, %c0_116, %c0_117] : memref<2x8x128xf32, #tpu.memory_space<vmem>>, vector<1x8x128xf32>
      %258 = vector.shape_cast %257 : vector<1x8x128xf32> to vector<8x128xf32>
      %259 = arith.truncf %258 : vector<8x128xf32> to vector<8x128xbf16>
      %c0_118 = arith.constant 0 : index
      %c0_119 = arith.constant 0 : index
      %260 = vector.load %arg9[%c0_118, %c0_119] : memref<128x4xbf16, #tpu.memory_space<vmem>>, vector<128x4xbf16>
      %cst_120 = arith.constant dense<0.000000e+00> : vector<8x4xf32>
      %261 = tpu.matmul %259, %260, %cst_120 {dimension_numbers = #tpu.dot_dimension_numbers<[1], [0], [0], [1], [0, 0, 1, 1], [], []>} : vector<8x128xbf16>, vector<128x4xbf16>, vector<8x4xf32> -> vector<8x4xf32>
      %c0_121 = arith.constant 0 : index
      %c0_122 = arith.constant 0 : index
      %262 = vector.load %arg10[%c0_121, %c0_122] : memref<1x4xf32, #tpu.memory_space<vmem>>, vector<1x4xf32>
      %263 = vector.broadcast %262 : vector<1x4xf32> to vector<8x4xf32>
      %264 = arith.addf %261, %263 : vector<8x4xf32>
      %c0_123 = arith.constant 0 : index
      %c0_124 = arith.constant 0 : index
      %265 = vector.load %arg11[%c0_123, %c0_124] : memref<8x4xf32, #tpu.memory_space<vmem>>, vector<8x4xf32>
      tpu.vector_store %arg11[%c0_123, %c0_124], %264 {strides = array<i32>} : memref<8x4xf32, #tpu.memory_space<vmem>>, vector<8x4xf32>,
    } else {
    }
    return
  }
  func.func @transform_0(%arg0: i32, %arg1: i32) -> (i32, i32) {
    %c2_i32 = arith.constant 2 : i32
    %0 = arith.muli %arg0, %c2_i32 : i32
    %1 = arith.addi %0, %arg1 : i32
    %c0_i32 = arith.constant 0 : i32
    %c0_i32_0 = arith.constant 0 : i32
    return %1, %c0_i32 : i32, i32
  }
  func.func @transform_1(%arg0: i32, %arg1: i32) -> (i32, i32) {
    %c0_i32 = arith.constant 0 : i32
    %c0_i32_0 = arith.constant 0 : i32
    %c0_i32_1 = arith.constant 0 : i32
    return %c0_i32, %c0_i32_0 : i32, i32
  }
  func.func @transform_2(%arg0: i32, %arg1: i32) -> (i32, i32) {
    %c0_i32 = arith.constant 0 : i32
    %c0_i32_0 = arith.constant 0 : i32
    %c0_i32_1 = arith.constant 0 : i32
    return %c0_i32, %c0_i32_0 : i32, i32
  }
  func.func @transform_3(%arg0: i32, %arg1: i32) -> (i32, i32) {
    %c0_i32 = arith.constant 0 : i32
    %c0_i32_0 = arith.constant 0 : i32
    %c0_i32_1 = arith.constant 0 : i32
    return %c0_i32, %c0_i32_0 : i32, i32
  }
  func.func @transform_4(%arg0: i32, %arg1: i32) -> (i32, i32) {
    %c0_i32 = arith.constant 0 : i32
    %c0_i32_0 = arith.constant 0 : i32
    %c0_i32_1 = arith.constant 0 : i32
    return %c0_i32, %c0_i32_0 : i32, i32
  }
  func.func @transform_5(%arg0: i32, %arg1: i32) -> (i32, i32) {
    %c0_i32 = arith.constant 0 : i32
    %c0_i32_0 = arith.constant 0 : i32
    %c0_i32_1 = arith.constant 0 : i32
    return %c0_i32, %c0_i32_0 : i32, i32
  }
  func.func @transform_6(%arg0: i32, %arg1: i32) -> (i32, i32) {
    %c0_i32 = arith.constant 0 : i32
    %c0_i32_0 = arith.constant 0 : i32
    %c0_i32_1 = arith.constant 0 : i32
    return %c0_i32, %c0_i32_0 : i32, i32
  }
  func.func @transform_7(%arg0: i32, %arg1: i32) -> (i32, i32) {
    %c0_i32 = arith.constant 0 : i32
    %c0_i32_0 = arith.constant 0 : i32
    %c0_i32_1 = arith.constant 0 : i32
    return %c0_i32, %c0_i32_0 : i32, i32
  }
  func.func @transform_8(%arg0: i32, %arg1: i32) -> (i32, i32) {
    %c0_i32 = arith.constant 0 : i32
    %c0_i32_0 = arith.constant 0 : i32
    %c0_i32_1 = arith.constant 0 : i32
    return %c0_i32, %c0_i32_0 : i32, i32
  }
  func.func @transform_9(%arg0: i32, %arg1: i32) -> (i32, i32) {
    %c0_i32 = arith.constant 0 : i32
    %c0_i32_0 = arith.constant 0 : i32
    return %arg0, %c0_i32 : i32, i32
  }
}

</mosaic_0001>

<bundles_post_ra>
// kernel: lstm_classifier_forward.1
= control target key start
LH: loop header
LB: loop body
LE: loop exit
PB: predicated region body
PF: predicated region fallthrough
CT: control target
= control target key end

     0   :  { %14 = vsyncpa [#allocation7], 0  ;;  %s4463_s0 = inlined_call_operand.vmem [shape: bf16[64,16], index: 0, kind: input, shape index: {}]   ;;  %s4464_s1 = inlined_call_operand.vmem [shape: bf16[16,512], index: 1, kind: input, shape index: {}]   ;;  %s4465_s2 = inlined_call_operand.hbm [shape: bf16[128,512], index: 2, kind: input, shape index: {}]   ;;  %s4466_s3 = inlined_call_operand.vmem [shape: f32[1,512], index: 3, kind: input, shape index: {}]   ;;  %s4467_s4 = inlined_call_operand.hbm [shape: bf16[128,512], index: 4, kind: input, shape index: {}]   ;;  %s4468_s5 = inlined_call_operand.hbm [shape: bf16[128,512], index: 5, kind: input, shape index: {}]   ;;  %s4469_s6 = inlined_call_operand.vmem [shape: f32[1,512], index: 6, kind: input, shape index: {}]   ;;  %s4470_s7 = inlined_call_operand.vmem [shape: bf16[128,4], index: 7, kind: input, shape index: {}]   ;;  %s4471_s8 = inlined_call_operand.vmem [shape: f32[1,4], index: 8, kind: input, shape index: {}]   ;;  %s4472_s9 = inlined_call_operand.vmem [shape: f32[8,4], index: 9, kind: output, shape index: {}]  }
   0x1   :  { %15 = vsyncpa [#allocation9], 0  ;;  %s3743_s30 = smov 0   ;;  %s3745_s10 = smov 0  }
   0x2   :  { %s3747_s11 = smov 0  }
   0x3 LB: > { %s3016_s12 = sadd.s32 4294967295, %s3682_s11   ;;  %p3017_p0 = scmp.ge.s32.totalorder %s3682_s11, 1  ;;  %s3682_s11 = sphi %s3747_s11, %s21_s11   ;;  %s3678_s10 = sphi %s3745_s10, %s4515_s10   ;;  %s3674_s30 = sphi %s3743_s30, %s4514_s30  }
   0x4   : > { %p262_p1 = scmp.lt.s32.totalorder %s3682_s11, 3  ;;  %p3761_p2 = scmp.eq.s32.totalorder %s3016_s12, 0 }
   0x5   : > { %s3684_s15 = smov [#allocation8]   ;;  %s30_s18 = sadd.s32 1, %s3678_s10 }
   0x6   : > { %p3765_p3 = pnand %p3017_p0, %p262_p1  ;;  %s293_s16 = sshll.u32 %s3684_s15, 4  ;;  %s294_s16 = int_to_ptr.vmem [resolvable:$true] %s293_s16 }
   0x7   : > { %p3778_p6 = scmp.ge.s32.totalorder %s30_s18, 2  ;;  %s3685_s20 = smov [#allocation6]  }
   0x8   : > { %p3285_p4 = pneg %p3765_p3  ;;  %s277_s21 = sshll.u32 %s3685_s20, 4  ;;  %s278_s21 = int_to_ptr.vmem [resolvable:$true] %s277_s21 }
   0x9   : > { %s3585_s22 = scalar_lea.vmem %s294_s16, 4096  ;;  %p3593_p11 = scmp.lt.s32.totalorder %s294_s16, %s294_s16 }
   0xa   : > { %p3773_p5 = pnand %p3761_p2, %p3285_p4  ;;  %p3586_p8 = scmp.ne.s32.totalorder %s294_s16, %s3585_s22 }
   0xb   : > { %p3594_p12 = scmp.lt.s32.totalorder %s3585_s22, %s3585_s22 }
   0xc   : > { %p3576_p7 = pneg %p3773_p5 }
   0xd   : > { %p3595_p13 = por %p3594_p12, %p3593_p11 }
   0xe   : > { %p3588_p9 = pnand %p3586_p8, %p3576_p7 }
  0x10   : > { %p3589_p10 = pneg %p3588_p9 }
  0x12   : > { %p3596_p0 = pnand %p3595_p13, %p3589_p10 }
  0x14   : > { %3599 = shalt.err (!%p3596_p0)
}
  0x15   : > { %s3686_s23 = smov 256   ;;  %s3687_s24 = smov 16  }
  0x16   : > { %3291 = dma.hbm_to_vmem [thread:$0]  (!%p3773_p5), %s4467_s4, 4096, %s294_s16, [#allocation9], %s3686_s23, %s3686_s23, %s3687_s24  }
  0x17   : > { %s4517_s18 = smov (%p3778_p6, %s30_s18), 0  ;;  %s3611_s27 = scalar_lea.vmem %s278_s21, 4096 }
  0x18   : > { %p3612_p1 = scmp.ne.s32.totalorder %s278_s21, %s3611_s27  ;;  %p3619_p9 = scmp.lt.s32.totalorder %s278_s21, %s278_s21 }
  0x19   : > { %p3620_p10 = scmp.lt.s32.totalorder %s3611_s27, %s3611_s27 }
  0x1a   : > { %p3614_p4 = pnand %p3612_p1, %p3576_p7 }
  0x1b   : > { %p3621_p11 = por %p3620_p10, %p3619_p9 }
  0x1c   : > { %p3615_p8 = pneg %p3614_p4 }
  0x1e   : > { %p3622_p12 = pnand %p3621_p11, %p3615_p8 }
  0x20   : > { %3625 = shalt.err (!%p3622_p12)
}
  0x21   : > { %3288 = dma.hbm_to_vmem [thread:$0]  (!%p3773_p5), %s4465_s2, 4096, %s278_s21, [#allocation7], %s3686_s23, %s3686_s23, %s3687_s24  }
  0x22   : > { %s3688_s12 = smov [#allocation10]  }
  0x23   : > { %s306_s15 = sshll.u32 %s3688_s12, 4  ;;  %s307_s15 = int_to_ptr.vmem [resolvable:$true] %s306_s15 }
  0x24   : > { %s3637_s16 = scalar_lea.vmem %s307_s15, 4096  ;;  %p3645_p1 = scmp.lt.s32.totalorder %s307_s15, %s307_s15 }
  0x25   : > { %p3638_p6 = scmp.ne.s32.totalorder %s307_s15, %s3637_s16  ;;  %p3646_p4 = scmp.lt.s32.totalorder %s3637_s16, %s3637_s16 }
  0x27   : > { %p3640_p13 = pnand %p3638_p6, %p3576_p7  ;;  %p3647_p8 = por %p3646_p4, %p3645_p1 }
  0x29   : > { %p3641_p0 = pneg %p3640_p13 }
  0x2b   : > { %p3648_p9 = pnand %p3647_p8, %p3641_p0 }
  0x2d   : > { %3651 = shalt.err (!%p3648_p9)
}
  0x2e   : > { %3294 = dma.hbm_to_vmem [thread:$0]  (!%p3773_p5), %s4468_s5, 4096, %s307_s15, [#allocation9], %s3686_s23, %s3686_s23, %s3687_s24  }
  0x2f   : > { %344 = sbr.rel (%p3765_p3) target bundleno = 2254 (0x8ce), region = 56 }
  0x34   : > { %3665 = dma.done.wait (%p3761_p2), [#allocation7], 4096  }
  0x35   : > { %3667 = vsyncadd (%p3761_p2), [#allocation7], 4294963200 }
  0x36   : > { %3669 = dma.done.wait (%p3761_p2), [#allocation9], 8192  }
  0x37   : > { %3671 = vsyncadd (%p3761_p2), [#allocation9], 4294959104  ;;  %s3026_s17 = sshll.u32 %s3674_s30, 2  ;;  %p3028_p3 = scmp.ne.s32.totalorder %s3674_s30, 0 }
  0x38   : > { %p392_p7 = scmp.lt.s32.totalorder %s3026_s17, 7 }
  0x39   : > { %407 = sbr.rel (%p3028_p3) target bundleno = 65 (0x41), region = 72 }
  0x3a   : > { %s4519_s17 = smov (!%p392_p7, %s3026_s17), 7 }
  0x3b   : > { %s3027_s21 = sshll.u32 %s4519_s17, 2 }
  0x3c   : > { %s3835_s23 = scalar_lea.vmem %s4463_s0, %s3027_s21 }
  0x3e   : > { %v3689_v0 = vmov 0.0  }
  0x3f   : > { %408 = vst [vmem:[#allocation2] sm:$0xff] %v3689_v0  ;;  %409 = vst [vmem:[#allocation2 + $0x8] sm:$0xff] %v3689_v0 }
  0x40   : > { %410 = vst [vmem:[#allocation3 + $0x8] sm:$0xff] %v3689_v0  ;;  %411 = vst [vmem:[#allocation3] sm:$0xff] %v3689_v0 }
  0x41 PF: > { %v3334_v1 = vld [vmem:[%s4464_s1 + $0x4] ss:$16 sps:$4 sm:$0xff]   ;;  %v3336_v2 = vld [vmem:[%s4464_s1 + $0xc] ss:$16 sps:$4 sm:$0xff]   ;;  %v4477_v3 = vmov 0   ;;  %vm472_vm0 = vcmask 130048   ;;  %v422_v42 = vlaneseq }
  0x42   : > { %511 = vmatprep.mubr.bf16.mxu0 %v4477_v3  ;;  %564 = vmatprep.mubr.bf16.mxu1 %v4477_v3  ;;  %v3338_v4 = vld [vmem:[%s4464_s1] ss:$16 sps:$4 sm:$0xff]   ;;  %v3339_v5 = vld [vmem:[%s4464_s1 + $0x8] ss:$16 sps:$4 sm:$0xff]   ;;  %v3855_v8 = vld [vmem:[#allocation6 + $0xe4] ss:$16 sps:$4 sm:$0xff]  }
  0x43   : > { %493 = vmatprep.subr.bf16.mxu0 %v3334_v1  ;;  %546 = vmatprep.subr.bf16.mxu1 %v3336_v2  ;;  %v3340_v6 = vld [vmem:[%s3835_s23] sm:$0xff]   ;;  %v3857_v9 = vld [vmem:[#allocation6 + $0xe8] ss:$16 sps:$4 sm:$0xff]   ;;  %v3860_v10 = vld [vmem:[#allocation6 + $0xec] ss:$16 sps:$4 sm:$0xff]   ;;  %v3994_v43 = vshrl.u32 %v422_v42, 7 }
  0x44   : > { %494 = vmatpush1.bf16.msra.mxu0 %v3338_v4  ;;  %547 = vmatpush1.bf16.msra.mxu1 %v3339_v5  ;;  %v3853_v7 = vld [vmem:[#allocation6 + $0xe0] ss:$16 sps:$4 sm:$0xff]   ;;  %v3864_v11 = vld [vmem:[#allocation6 + $0xc4] ss:$16 sps:$4 sm:$0xff]   ;;  %v3870_v13 = vld [vmem:[#allocation6 + $0xcc] ss:$16 sps:$4 sm:$0xff]  }
  0x45   : > { %803 = vmatprep.subr.bf16.mxu0 %v3855_v8  ;;  %844 = vmatprep.subr.bf16.mxu1 %v3860_v10  ;;  %v3868_v12 = vld [vmem:[#allocation6 + $0xc0] ss:$16 sps:$4 sm:$0xff]   ;;  %v3874_v14 = vld [vmem:[#allocation6 + $0xc8] ss:$16 sps:$4 sm:$0xff]   ;;  %v3877_v15 = vld [vmem:[#allocation6 + $0xa4] ss:$16 sps:$4 sm:$0xff]  }
  0x46   : > { %v3880_v16 = vld [vmem:[#allocation6 + $0xac] ss:$16 sps:$4 sm:$0xff]   ;;  %v3884_v17 = vld [vmem:[#allocation6 + $0xa0] ss:$16 sps:$4 sm:$0xff]   ;;  %v3886_v18 = vld [vmem:[#allocation6 + $0xa8] ss:$16 sps:$4 sm:$0xff]  }
  0x47   : > { %3035 = vmatmul.mubr.msk.bf16.vlgmr.msra.gmra.mxu0 %vm472_vm0, %v3340_v6  ;;  %3037 = vmatmul.mubr.msk.bf16.vlgmr.msra.gmra.mxu1 %vm472_vm0, %v3340_v6  ;;  %v3890_v19 = vld [vmem:[#allocation6 + $0x84] ss:$16 sps:$4 sm:$0xff]   ;;  %v3893_v20 = vld [vmem:[#allocation6 + $0x8c] ss:$16 sps:$4 sm:$0xff]   ;;  %v3895_v21 = vld [vmem:[#allocation6 + $0x80] ss:$16 sps:$4 sm:$0xff]  }
  0x48   : > { %804 = vmatpush1.bf16.msra.mxu0 %v3853_v7  ;;  %845 = vmatpush1.bf16.msra.mxu1 %v3857_v9  ;;  %v3898_v22 = vld [vmem:[#allocation6 + $0x88] ss:$16 sps:$4 sm:$0xff]   ;;  %v3900_v23 = vld [vmem:[#allocation6 + $0x64] ss:$16 sps:$4 sm:$0xff]   ;;  %v3906_v25 = vld [vmem:[#allocation6 + $0x6c] ss:$16 sps:$4 sm:$0xff]  }
  0x49   : > { %805 = vmatprep.subr.bf16.mxu0 %v3864_v11  ;;  %846 = vmatprep.subr.bf16.mxu1 %v3870_v13  ;;  %v3371_v24 = vld [vmem:[%s3835_s23 + $0x8] sm:$0xff]   ;;  %v3911_v26 = vld [vmem:[#allocation6 + $0x60] ss:$16 sps:$4 sm:$0xff]   ;;  %v3918_v28 = vld [vmem:[#allocation6 + $0x44] ss:$16 sps:$4 sm:$0xff]   ;;  %4485 = vst [vmem:[#allocation13_spill] sm:$0xff] %v3994_v43 }
  0x4a   : > { %521 = vmatprep.mubr.bf16.mxu0 %v4477_v3  ;;  %574 = vmatprep.mubr.bf16.mxu1 %v4477_v3  ;;  %v3916_v27 = vld [vmem:[#allocation6 + $0x68] ss:$16 sps:$4 sm:$0xff]   ;;  %v3921_v29 = vld [vmem:[#allocation6 + $0x4c] ss:$16 sps:$4 sm:$0xff]   ;;  %v3925_v30 = vld [vmem:[#allocation6 + $0x40] ss:$16 sps:$4 sm:$0xff]  }
  0x4b   : > { %v3929_v31 = vld [vmem:[#allocation6 + $0x48] ss:$16 sps:$4 sm:$0xff]   ;;  %v3931_v32 = vld [vmem:[#allocation6 + $0x24] ss:$16 sps:$4 sm:$0xff]   ;;  %v3934_v33 = vld [vmem:[#allocation6 + $0x20] ss:$16 sps:$4 sm:$0xff]  }
  0x4c   : > { %806 = vmatpush1.bf16.msra.mxu0 %v3868_v12  ;;  %847 = vmatpush1.bf16.msra.mxu1 %v3874_v14  ;;  %v3936_v34 = vld [vmem:[#allocation6 + $0x2c] ss:$16 sps:$4 sm:$0xff]   ;;  %v3938_v35 = vld [vmem:[#allocation6 + $0x28] ss:$16 sps:$4 sm:$0xff]   ;;  %v3940_v36 = vld [vmem:[#allocation6 + $0x4] ss:$16 sps:$4 sm:$0xff]  }
  0x4d   : > { %807 = vmatprep.subr.bf16.mxu0 %v3877_v15  ;;  %848 = vmatprep.subr.bf16.mxu1 %v3880_v16  ;;  %v3943_v37 = vld [vmem:[#allocation6 + $0xc] ss:$16 sps:$4 sm:$0xff]   ;;  %v3948_v38 = vld [vmem:[#allocation6] ss:$16 sps:$4 sm:$0xff]   ;;  %v3950_v40 = vld [vmem:[#allocation6 + $0x8] ss:$16 sps:$4 sm:$0xff]  }
  0x4e   : > { %v601_v39 = vld [vmem:[#allocation2] sm:$0xff]  ;;  %v4473_v44 = vsub.s32 2, %v3994_v43  ;;  %v4476_v45 = vsub.s32 0, %v3994_v43  ;;  %v4474_v46 = vsub.s32 3, %v3994_v43  ;;  %v4475_v51 = vsub.s32 1, %v3994_v43  ;;  %p3231_p2 = scmp.ne.s32.totalorder %s3674_s30, 1 }
  0x4f   : > { %3036 = vmatmul.mubr.msk.bf16.gmra.mxu0 %vm472_vm0, %v3371_v24  ;;  %3038 = vmatmul.mubr.msk.bf16.gmra.mxu1 %vm472_vm0, %v3371_v24  ;;  %v610_v41 = vpack.c.bf16 %v601_v39, %v601_v39  ;;  %v420_v47 = vld [vmem:[%s4466_s3] sm:$0xf] }
  0x50   : > { %808 = vmatpush1.bf16.msra.mxu0 %v3884_v17  ;;  %849 = vmatpush1.bf16.msra.mxu1 %v3886_v18  ;;  %v433_v50 = vrot.slane %v420_v47, %v4473_v44  ;;  %v425_v54 = vrot.slane %v420_v47, %v4476_v45  ;;  %v437_v55 = vrot.slane %v420_v47, %v4474_v46 }
  0x51   : > { %809 = vmatprep.subr.bf16.mxu0 %v3890_v19  ;;  %850 = vmatprep.subr.bf16.mxu1 %v3893_v20  ;;  %v429_v58 = vrot.slane %v420_v47, %v4475_v51 }
  0x52   : > { %835 = vmatprep.mubr.bf16.mxu0 %v4477_v3  ;;  %876 = vmatprep.mubr.bf16.mxu1 %v4477_v3 }
  0x54   : > { %810 = vmatpush1.bf16.msra.mxu0 %v3895_v21  ;;  %851 = vmatpush1.bf16.msra.mxu1 %v3898_v22 }
  0x55   : > { %811 = vmatprep.subr.bf16.mxu0 %v3900_v23  ;;  %852 = vmatprep.subr.bf16.mxu1 %v3906_v25 }
  0x58   : > { %812 = vmatpush1.bf16.msra.mxu0 %v3911_v26  ;;  %853 = vmatpush1.bf16.msra.mxu1 %v3916_v27 }
  0x59   : > { %813 = vmatprep.subr.bf16.mxu0 %v3918_v28  ;;  %854 = vmatprep.subr.bf16.mxu1 %v3921_v29 }
  0x5c   : > { %814 = vmatpush1.bf16.msra.mxu0 %v3925_v30  ;;  %855 = vmatpush1.bf16.msra.mxu1 %v3929_v31 }
  0x5d   : > { %815 = vmatprep.subr.bf16.mxu0 %v3931_v32  ;;  %856 = vmatprep.subr.bf16.mxu1 %v3936_v34 }
  0x60   : > { %816 = vmatpush1.bf16.msra.mxu0 %v3934_v33  ;;  %857 = vmatpush1.bf16.msra.mxu1 %v3938_v35 }
  0x61   : > { %817 = vmatprep.subr.bf16.mxu0 %v3940_v36  ;;  %858 = vmatprep.subr.bf16.mxu1 %v3943_v37 }
  0x64   : > { %818 = vmatpush1.bf16.msra.mxu0 %v3948_v38  ;;  %859 = vmatpush1.bf16.msra.mxu1 %v3950_v40 }
  0x65   : > { %1108 = vmatprep.subr.bf16.mxu0 %v3855_v8  ;;  %1149 = vmatprep.subr.bf16.mxu1 %v3860_v10 }
  0x67   : > { %836 = vmatmul.mubr.bf16.vlgmr.msra.gmra.mxu0 %v610_v41  ;;  %877 = vmatmul.mubr.bf16.vlgmr.msra.gmra.mxu1 %v610_v41 }
  0x68   : > { %1109 = vmatpush1.bf16.msra.mxu0 %v3853_v7  ;;  %1150 = vmatpush1.bf16.msra.mxu1 %v3857_v9 }
  0x69   : > { %1110 = vmatprep.subr.bf16.mxu0 %v3864_v11  ;;  %1151 = vmatprep.subr.bf16.mxu1 %v3870_v13 }
  0x6a   : > { %1140 = vmatprep.mubr.bf16.mxu0 %v4477_v3  ;;  %1181 = vmatprep.mubr.bf16.mxu1 %v4477_v3 }
  0x6c   : > { %1111 = vmatpush1.bf16.msra.mxu0 %v3868_v12  ;;  %1152 = vmatpush1.bf16.msra.mxu1 %v3874_v14 }
  0x6d   : > { %1112 = vmatprep.subr.bf16.mxu0 %v3877_v15  ;;  %1153 = vmatprep.subr.bf16.mxu1 %v3880_v16 }
  0x70   : > { %1113 = vmatpush1.bf16.msra.mxu0 %v3884_v17  ;;  %1154 = vmatpush1.bf16.msra.mxu1 %v3886_v18 }
  0x71   : > { %1114 = vmatprep.subr.bf16.mxu0 %v3890_v19  ;;  %1155 = vmatprep.subr.bf16.mxu1 %v3893_v20 }
  0x74   : > { %1115 = vmatpush1.bf16.msra.mxu0 %v3895_v21  ;;  %1156 = vmatpush1.bf16.msra.mxu1 %v3898_v22 }
  0x75   : > { %1116 = vmatprep.subr.bf16.mxu0 %v3900_v23  ;;  %1157 = vmatprep.subr.bf16.mxu1 %v3906_v25 }
  0x78   : > { %1117 = vmatpush1.bf16.msra.mxu0 %v3911_v26  ;;  %1158 = vmatpush1.bf16.msra.mxu1 %v3916_v27 }
  0x79   : > { %1118 = vmatprep.subr.bf16.mxu0 %v3918_v28  ;;  %1159 = vmatprep.subr.bf16.mxu1 %v3921_v29 }
  0x7c   : > { %1119 = vmatpush1.bf16.msra.mxu0 %v3925_v30  ;;  %1160 = vmatpush1.bf16.msra.mxu1 %v3929_v31 }
  0x7d   : > { %1120 = vmatprep.subr.bf16.mxu0 %v3931_v32  ;;  %1161 = vmatprep.subr.bf16.mxu1 %v3936_v34 }
  0x80   : > { %1121 = vmatpush1.bf16.msra.mxu0 %v3934_v33  ;;  %1162 = vmatpush1.bf16.msra.mxu1 %v3938_v35 }
  0x81   : > { %1122 = vmatprep.subr.bf16.mxu0 %v3940_v36  ;;  %1163 = vmatprep.subr.bf16.mxu1 %v3943_v37 }
  0x84   : > { %1123 = vmatpush1.bf16.msra.mxu0 %v3948_v38  ;;  %1164 = vmatpush1.bf16.msra.mxu1 %v3950_v40 }
  0x85   : > { %1414 = vmatprep.subr.bf16.mxu0 %v3855_v8  ;;  %1455 = vmatprep.subr.bf16.mxu1 %v3860_v10 }
 0x107   : > { %v513_v48 = vpop.f32.mrf.mxu0  ;;  %v566_v49 = vpop.f32.mrf.mxu1 }
 0x109   : > { %v515_v52 = vpop.f32.mrf.mxu0  ;;  %v568_v53 = vpop.f32.mrf.mxu1 }
 0x10a   : > { %v516_v51 = vadd.f32 %v515_v52, %v429_v58 }
 0x10b   : > { %v517_v56 = vpop.f32.mrf.mxu0  ;;  %v570_v57 = vpop.f32.mrf.mxu1 }
 0x10c   : > { %v4011_v59 = vadd.f32 %v517_v56, %v425_v54  ;;  %v4013_v60 = vadd.f32 %v570_v57, %v433_v50 }
 0x10d   : > { %v519_v61 = vpop.f32.mrf.mxu0  ;;  %v572_v62 = vpop.f32.mrf.mxu1 }
 0x10e   : > { %v4015_v63 = vadd.f32 %v519_v61, %v429_v58  ;;  %v4017_v0 = vadd.f32 %v572_v62, %v437_v55 }
 0x10f   : > { %v523_v1 = vpop.f32.mrf.mxu0  ;;  %v576_v2 = vpop.f32.mrf.mxu1 }
 0x110   : > { %v4019_v4 = vadd.f32 %v523_v1, %v425_v54  ;;  %v4021_v5 = vadd.f32 %v576_v2, %v433_v50  ;;  %v514_v2 = vadd.f32 %v513_v48, %v425_v54 }
 0x111   : > { %v525_v6 = vpop.f32.mrf.mxu0  ;;  %v578_v24 = vpop.f32.mrf.mxu1 }
 0x112   : > { %4486 = vst [vmem:[#allocation14_spill] sm:$0xff] %v4021_v5  ;;  %v4023_v39 = vadd.f32 %v525_v6, %v429_v58  ;;  %v4025_v41 = vadd.f32 %v578_v24, %v437_v55 }
 0x113   : > { %v527_v42 = vpop.f32.mrf.mxu0  ;;  %v580_v47 = vpop.f32.mrf.mxu1 }
 0x114   : > { %4487 = vst [vmem:[#allocation15_spill] sm:$0xff] %v4025_v41  ;;  %v4027_v56 = vadd.f32 %v527_v42, %v425_v54  ;;  %v4029_v57 = vadd.f32 %v580_v47, %v433_v50  ;;  %v569_v42 = vadd.f32 %v568_v53, %v437_v55 }
 0x115   : > { %v529_v61 = vpop.f32.mrf.mxu0  ;;  %v582_v62 = vpop.f32.mrf.mxu1 }
 0x116   : > { %4488 = vst [vmem:[#allocation16_spill] sm:$0xff] %v4027_v56  ;;  %4489 = vst [vmem:[#allocation17_spill] sm:$0xff] %v4029_v57  ;;  %v4031_v44 = vadd.f32 %v529_v61, %v429_v58  ;;  %v4033_v1 = vadd.f32 %v582_v62, %v437_v55  ;;  %v567_v62 = vadd.f32 %v566_v49, %v433_v50 }
 0x118   : > { %4490 = vst [vmem:[#allocation18_spill] sm:$0xff] %v4031_v44 }
 0x127   : > { %v837_v46 = vpop.f32.mrf.mxu0  ;;  %v878_v6 = vpop.f32.mrf.mxu1 }
 0x128   : > { %v885_v45 = vadd.f32 %v837_v46, %v514_v2  ;;  %v887_v48 = vadd.f32 %v878_v6, %v567_v62  ;;  %v4491_v6 = vmov 0  }
 0x129   : > { %v839_v3 = vpop.f32.mrf.mxu0  ;;  %v880_v5 = vpop.f32.mrf.mxu1 }
 0x12a   : > { %v889_v24 = vmul.f32 0.5, %v885_v45  ;;  %v886_v43 = vadd.f32 %v839_v3, %v516_v51  ;;  %v888_v61 = vadd.f32 %v880_v5, %v569_v42  ;;  %v891_v54 = vmul.f32 0.5, %v887_v48  ;;  %v602_v45 = vld [vmem:[#allocation3 + $0x8] sm:$0xff] }
 0x12b   : > { %v841_v41 = vpop.f32.mrf.mxu0  ;;  %v882_v57 = vpop.f32.mrf.mxu1 }
 0x12c   : > { %3486 = vtanh.f32 %v889_v24  ;;  %v890_v47 = vmul.f32 0.5, %v886_v43 }
 0x12d   : > { %v842_v56 = vpop.f32.mrf.mxu0  ;;  %v883_v44 = vpop.f32.mrf.mxu1 }
 0x12e   : > { %3488 = vtanh.f32 %v890_v47 }
 0x12f   : > { %3490 = vtanh.f32 %v888_v61 }
 0x130   : > { %3492 = vtanh.f32 %v891_v54 }
 0x139   : > { %v3487_v52 = vpop.eup %3486 }
 0x13a   : > { %v895_v46 = vmul.f32 0.5, %v3487_v52 }
 0x13b   : > { %v3489_v58 = vpop.eup %3488 }
 0x13c   : > { %v898_v2 = vadd.f32 0.5, %v895_v46  ;;  %v896_v3 = vmul.f32 0.5, %v3489_v58  ;;  %v3491_v53 = vpop.eup %3490 }
 0x13d   : > { %v3493_v44 = vpop.eup %3492 }
 0x13e   : > { %v899_v51 = vadd.f32 0.5, %v896_v3  ;;  %v903_v43 = vmul.f32 %v3491_v53, %v898_v2  ;;  %v897_v49 = vmul.f32 0.5, %v3493_v44 }
 0x140   : > { %v902_v55 = vmul.f32 %v899_v51, %v602_v45  ;;  %v900_v50 = vadd.f32 0.5, %v897_v49 }
 0x142   : > { %v4035_v41 = vadd.f32 %v903_v43, %v902_v55 }
 0x144   : > { %3494 = vtanh.f32 %v4035_v41 }
 0x151   : > { %v3495_v5 = vpop.eup %3494 }
 0x152   : > { %v4038_v56 = vmul.f32 %v3495_v5, %v900_v50 }
 0x154   : > { %v915_v57 = vpack.c.bf16 %v4038_v56, %v4038_v56 }
 0x156   : > { %1141 = vmatmul.mubr.bf16.vlgmr.msra.gmra.mxu0 %v915_v57  ;;  %1182 = vmatmul.mubr.bf16.vlgmr.msra.gmra.mxu1 %v915_v57 }
 0x157   : > { %1415 = vmatpush1.bf16.msra.mxu0 %v3853_v7  ;;  %1456 = vmatpush1.bf16.msra.mxu1 %v3857_v9 }
 0x158   : > { %1416 = vmatprep.subr.bf16.mxu0 %v3864_v11  ;;  %1457 = vmatprep.subr.bf16.mxu1 %v3870_v13 }
 0x159   : > { %1446 = vmatprep.mubr.bf16.mxu0 %v4491_v6  ;;  %1487 = vmatprep.mubr.bf16.mxu1 %v4491_v6 }
 0x15b   : > { %1417 = vmatpush1.bf16.msra.mxu0 %v3868_v12  ;;  %1458 = vmatpush1.bf16.msra.mxu1 %v3874_v14 }
 0x15c   : > { %1418 = vmatprep.subr.bf16.mxu0 %v3877_v15  ;;  %1459 = vmatprep.subr.bf16.mxu1 %v3880_v16 }
 0x15f   : > { %1419 = vmatpush1.bf16.msra.mxu0 %v3884_v17  ;;  %1460 = vmatpush1.bf16.msra.mxu1 %v3886_v18 }
 0x160   : > { %1420 = vmatprep.subr.bf16.mxu0 %v3890_v19  ;;  %1461 = vmatprep.subr.bf16.mxu1 %v3893_v20 }
 0x163   : > { %1421 = vmatpush1.bf16.msra.mxu0 %v3895_v21  ;;  %1462 = vmatpush1.bf16.msra.mxu1 %v3898_v22 }
 0x164   : > { %1422 = vmatprep.subr.bf16.mxu0 %v3900_v23  ;;  %1463 = vmatprep.subr.bf16.mxu1 %v3906_v25 }
 0x167   : > { %1423 = vmatpush1.bf16.msra.mxu0 %v3911_v26  ;;  %1464 = vmatpush1.bf16.msra.mxu1 %v3916_v27 }
 0x168   : > { %1424 = vmatprep.subr.bf16.mxu0 %v3918_v28  ;;  %1465 = vmatprep.subr.bf16.mxu1 %v3921_v29 }
 0x16b   : > { %1425 = vmatpush1.bf16.msra.mxu0 %v3925_v30  ;;  %1466 = vmatpush1.bf16.msra.mxu1 %v3929_v31 }
 0x16c   : > { %1426 = vmatprep.subr.bf16.mxu0 %v3931_v32  ;;  %1467 = vmatprep.subr.bf16.mxu1 %v3936_v34 }
 0x16f   : > { %1427 = vmatpush1.bf16.msra.mxu0 %v3934_v33  ;;  %1468 = vmatpush1.bf16.msra.mxu1 %v3938_v35 }
 0x170   : > { %1428 = vmatprep.subr.bf16.mxu0 %v3940_v36  ;;  %1469 = vmatprep.subr.bf16.mxu1 %v3943_v37 }
 0x173   : > { %1429 = vmatpush1.bf16.msra.mxu0 %v3948_v38  ;;  %1470 = vmatpush1.bf16.msra.mxu1 %v3950_v40 }
 0x174   : > { %1720 = vmatprep.subr.bf16.mxu0 %v3855_v8  ;;  %1761 = vmatprep.subr.bf16.mxu1 %v3860_v10 }
 0x216   : > { %v1142_v24 = vpop.f32.mrf.mxu0  ;;  %v1183_v42 = vpop.f32.mrf.mxu1 }
 0x217   : > { %v1190_v47 = vadd.f32 %v1142_v24, %v4011_v59  ;;  %v1192_v8 = vadd.f32 %v1183_v42, %v4013_v60 }
 0x218   : > { %v1144_v61 = vpop.f32.mrf.mxu0  ;;  %v1185_v62 = vpop.f32.mrf.mxu1 }
 0x219   : > { %v1194_v48 = vmul.f32 0.5, %v1190_v47  ;;  %v1191_v54 = vadd.f32 %v1144_v61, %v4015_v63  ;;  %v1193_v2 = vadd.f32 %v1185_v62, %v4017_v0  ;;  %v1196_v10 = vmul.f32 0.5, %v1192_v8  ;;  %v3390_v62 = vld [vmem:[#allocation8 + $0xe0] ss:$16 sps:$4 sm:$0xff]  }
 0x21a   : > { %v1146_v52 = vpop.f32.mrf.mxu0  ;;  %v1187_v46 = vpop.f32.mrf.mxu1  ;;  %v3402_v8 = vld [vmem:[#allocation8 + $0xa0] ss:$16 sps:$4 sm:$0xff]  }
 0x21b   : > { %3496 = vtanh.f32 %v1194_v48  ;;  %v1195_v58 = vmul.f32 0.5, %v1191_v54  ;;  %v3393_v48 = vld [vmem:[#allocation8 + $0xe8] ss:$16 sps:$4 sm:$0xff]   ;;  %v3398_v52 = vld [vmem:[#allocation8 + $0xc4] ss:$16 sps:$4 sm:$0xff]  }
 0x21c   : > { %v1147_v3 = vpop.f32.mrf.mxu0  ;;  %v1188_v45 = vpop.f32.mrf.mxu1  ;;  %v3401_v46 = vld [vmem:[#allocation8 + $0xcc] ss:$16 sps:$4 sm:$0xff]  }
 0x21d   : > { %3498 = vtanh.f32 %v1195_v58  ;;  %v3396_v58 = vld [vmem:[#allocation8 + $0xc0] ss:$16 sps:$4 sm:$0xff]   ;;  %v3404_v3 = vld [vmem:[#allocation8 + $0xa4] ss:$16 sps:$4 sm:$0xff]   ;;  %v3407_v45 = vld [vmem:[#allocation8 + $0xac] ss:$16 sps:$4 sm:$0xff]  }
 0x21e   : > { %3500 = vtanh.f32 %v1193_v2  ;;  %v3399_v2 = vld [vmem:[#allocation8 + $0xc8] ss:$16 sps:$4 sm:$0xff]  }
 0x21f   : > { %3502 = vtanh.f32 %v1196_v10  ;;  %v3405_v10 = vld [vmem:[#allocation8 + $0xa8] ss:$16 sps:$4 sm:$0xff]  }
 0x228   : > { %v3497_v51 = vpop.eup %3496 }
 0x229   : > { %v1200_v59 = vmul.f32 0.5, %v3497_v51  ;;  %v3410_v51 = vld [vmem:[#allocation8 + $0x84] ss:$16 sps:$4 sm:$0xff]  }
 0x22a   : > { %v3499_v53 = vpop.eup %3498 }
 0x22b   : > { %v1203_v55 = vadd.f32 0.5, %v1200_v59  ;;  %v1201_v43 = vmul.f32 0.5, %v3499_v53  ;;  %v3501_v63 = vpop.eup %3500  ;;  %v3413_v59 = vld [vmem:[#allocation8 + $0x8c] ss:$16 sps:$4 sm:$0xff]   ;;  %v3408_v53 = vld [vmem:[#allocation8 + $0x80] ss:$16 sps:$4 sm:$0xff]  }
 0x22c   : > { %v3503_v0 = vpop.eup %3502 }
 0x22d   : > { %v1204_v44 = vadd.f32 0.5, %v1201_v43  ;;  %v1208_v49 = vmul.f32 %v3501_v63, %v1203_v55  ;;  %v1202_v57 = vmul.f32 0.5, %v3503_v0  ;;  %v3411_v55 = vld [vmem:[#allocation8 + $0x88] ss:$16 sps:$4 sm:$0xff]   ;;  %v3416_v43 = vld [vmem:[#allocation8 + $0x64] ss:$16 sps:$4 sm:$0xff]  }
 0x22e   : > { %v3419_v63 = vld [vmem:[#allocation8 + $0x6c] ss:$16 sps:$4 sm:$0xff]   ;;  %v3420_v0 = vld [vmem:[#allocation8 + $0x40] ss:$16 sps:$4 sm:$0xff]  }
 0x22f   : > { %v1207_v50 = vmul.f32 %v1204_v44, %v4035_v41  ;;  %v1205_v24 = vadd.f32 0.5, %v1202_v57  ;;  %v3414_v44 = vld [vmem:[#allocation8 + $0x60] ss:$16 sps:$4 sm:$0xff]   ;;  %v3423_v57 = vld [vmem:[#allocation8 + $0x48] ss:$16 sps:$4 sm:$0xff]  }
 0x231   : > { %v4081_v5 = vadd.f32 %v1208_v49, %v1207_v50  ;;  %v3417_v49 = vld [vmem:[#allocation8 + $0x68] ss:$16 sps:$4 sm:$0xff]   ;;  %v3422_v50 = vld [vmem:[#allocation8 + $0x44] ss:$16 sps:$4 sm:$0xff]  }
 0x233   : > { %3504 = vtanh.f32 %v4081_v5 }
 0x240   : > { %v3505_v60 = vpop.eup %3504 }
 0x241   : > { %v4084_v42 = vmul.f32 %v3505_v60, %v1205_v24  ;;  %v3428_v24 = vld [vmem:[#allocation8 + $0x24] ss:$16 sps:$4 sm:$0xff]   ;;  %v3431_v60 = vld [vmem:[#allocation8 + $0x2c] ss:$16 sps:$4 sm:$0xff]  }
 0x243   : > { %v1221_v47 = vpack.c.bf16 %v4084_v42, %v4084_v42 }
 0x245   : > { %1447 = vmatmul.mubr.bf16.vlgmr.msra.gmra.mxu0 %v1221_v47  ;;  %1488 = vmatmul.mubr.bf16.vlgmr.msra.gmra.mxu1 %v1221_v47  ;;  %v3426_v47 = vld [vmem:[#allocation8 + $0x20] ss:$16 sps:$4 sm:$0xff]  }
 0x246   : > { %1721 = vmatpush1.bf16.msra.mxu0 %v3853_v7  ;;  %1762 = vmatpush1.bf16.msra.mxu1 %v3857_v9  ;;  %v3392_v7 = vld [vmem:[#allocation8 + $0xe4] ss:$16 sps:$4 sm:$0xff]   ;;  %v3395_v9 = vld [vmem:[#allocation8 + $0xec] ss:$16 sps:$4 sm:$0xff]  }
 0x247   : > { %1722 = vmatprep.subr.bf16.mxu0 %v3864_v11  ;;  %1763 = vmatprep.subr.bf16.mxu1 %v3870_v13 }
 0x248   : > { %1752 = vmatprep.mubr.bf16.mxu0 %v4491_v6  ;;  %1793 = vmatprep.mubr.bf16.mxu1 %v4491_v6 }
 0x24a   : > { %1723 = vmatpush1.bf16.msra.mxu0 %v3868_v12  ;;  %1764 = vmatpush1.bf16.msra.mxu1 %v3874_v14 }
 0x24b   : > { %1724 = vmatprep.subr.bf16.mxu0 %v3877_v15  ;;  %1765 = vmatprep.subr.bf16.mxu1 %v3880_v16 }
 0x24e   : > { %1725 = vmatpush1.bf16.msra.mxu0 %v3884_v17  ;;  %1766 = vmatpush1.bf16.msra.mxu1 %v3886_v18 }
 0x24f   : > { %1726 = vmatprep.subr.bf16.mxu0 %v3890_v19  ;;  %1767 = vmatprep.subr.bf16.mxu1 %v3893_v20 }
 0x252   : > { %1727 = vmatpush1.bf16.msra.mxu0 %v3895_v21  ;;  %1768 = vmatpush1.bf16.msra.mxu1 %v3898_v22  ;;  %v4492_v21 = vld [vmem:[#allocation15_spill] sm:$0xff] }
 0x253   : > { %1728 = vmatprep.subr.bf16.mxu0 %v3900_v23  ;;  %1769 = vmatprep.subr.bf16.mxu1 %v3906_v25 }
 0x256   : > { %1729 = vmatpush1.bf16.msra.mxu0 %v3911_v26  ;;  %1770 = vmatpush1.bf16.msra.mxu1 %v3916_v27  ;;  %v4493_v26 = vld [vmem:[#allocation14_spill] sm:$0xff] }
 0x257   : > { %1730 = vmatprep.subr.bf16.mxu0 %v3918_v28  ;;  %1771 = vmatprep.subr.bf16.mxu1 %v3921_v29 }
 0x25a   : > { %1731 = vmatpush1.bf16.msra.mxu0 %v3925_v30  ;;  %1772 = vmatpush1.bf16.msra.mxu1 %v3929_v31 }
 0x25b   : > { %1732 = vmatprep.subr.bf16.mxu0 %v3931_v32  ;;  %1773 = vmatprep.subr.bf16.mxu1 %v3936_v34 }
 0x25e   : > { %1733 = vmatpush1.bf16.msra.mxu0 %v3934_v33  ;;  %1774 = vmatpush1.bf16.msra.mxu1 %v3938_v35 }
 0x25f   : > { %1734 = vmatprep.subr.bf16.mxu0 %v3940_v36  ;;  %1775 = vmatprep.subr.bf16.mxu1 %v3943_v37 }
 0x262   : > { %1735 = vmatpush1.bf16.msra.mxu0 %v3948_v38  ;;  %1776 = vmatpush1.bf16.msra.mxu1 %v3950_v40 }
 0x263   : > { %2048 = vmatprep.subr.bf16.mxu0 %v3392_v7  ;;  %2101 = vmatprep.subr.bf16.mxu1 %v3395_v9  ;;  %v3429_v7 = vld [vmem:[#allocation8 + $0x28] ss:$16 sps:$4 sm:$0xff]   ;;  %v3434_v9 = vld [vmem:[#allocation8 + $0x4] ss:$16 sps:$4 sm:$0xff]  }
 0x305   : > { %v1448_v11 = vpop.f32.mrf.mxu0  ;;  %v1489_v12 = vpop.f32.mrf.mxu1 }
 0x306   : > { %v1496_v13 = vadd.f32 %v1448_v11, %v4019_v4  ;;  %v1498_v27 = vadd.f32 %v1489_v12, %v4493_v26  ;;  %v3437_v11 = vld [vmem:[#allocation8 + $0xc] ss:$16 sps:$4 sm:$0xff]   ;;  %v3432_v12 = vld [vmem:[#allocation8] ss:$16 sps:$4 sm:$0xff]   ;;  %v4174_v26 = vld [vmem:[#allocation10 + $0x84] ss:$16 sps:$4 sm:$0xff]  }
 0x307   : > { %v1450_v14 = vpop.f32.mrf.mxu0  ;;  %v1491_v15 = vpop.f32.mrf.mxu1 }
 0x308   : > { %v1500_v16 = vmul.f32 0.5, %v1496_v13  ;;  %v1497_v17 = vadd.f32 %v1450_v14, %v4023_v39  ;;  %v1499_v22 = vadd.f32 %v1491_v15, %v4492_v21  ;;  %v1502_v28 = vmul.f32 0.5, %v1498_v27  ;;  %v3435_v13 = vld [vmem:[#allocation8 + $0x8] ss:$16 sps:$4 sm:$0xff]   ;;  %v4138_v15 = vld [vmem:[#allocation10 + $0xe4] ss:$16 sps:$4 sm:$0xff]  }
 0x309   : > { %v1452_v18 = vpop.f32.mrf.mxu0  ;;  %v1493_v19 = vpop.f32.mrf.mxu1  ;;  %v1832_v14 = vpack.c.bf16 %v4084_v42, %v4038_v56  ;;  %v4150_v56 = vld [vmem:[#allocation10 + $0xc4] ss:$16 sps:$4 sm:$0xff]   ;;  %v4152_v42 = vld [vmem:[#allocation10 + $0xcc] ss:$16 sps:$4 sm:$0xff]  }
 0x30a   : > { %3506 = vtanh.f32 %v1500_v16  ;;  %v1501_v20 = vmul.f32 0.5, %v1497_v17  ;;  %v4140_v16 = vld [vmem:[#allocation10 + $0xec] ss:$16 sps:$4 sm:$0xff]   ;;  %v4142_v17 = vld [vmem:[#allocation10 + $0xe0] ss:$16 sps:$4 sm:$0xff]  }
 0x30b   : > { %v1453_v23 = vpop.f32.mrf.mxu0  ;;  %v1494_v25 = vpop.f32.mrf.mxu1  ;;  %v4144_v18 = vld [vmem:[#allocation10 + $0xe8] ss:$16 sps:$4 sm:$0xff]   ;;  %v4154_v19 = vld [vmem:[#allocation10 + $0xc0] ss:$16 sps:$4 sm:$0xff]   ;;  %v4162_v21 = vld [vmem:[#allocation10 + $0xa4] ss:$16 sps:$4 sm:$0xff]  }
 0x30c   : > { %3508 = vtanh.f32 %v1501_v20  ;;  %v4156_v20 = vld [vmem:[#allocation10 + $0xc8] ss:$16 sps:$4 sm:$0xff]   ;;  %v4166_v23 = vld [vmem:[#allocation10 + $0xa0] ss:$16 sps:$4 sm:$0xff]   ;;  %v4176_v27 = vld [vmem:[#allocation10 + $0x8c] ss:$16 sps:$4 sm:$0xff]  }
 0x30d   : > { %3510 = vtanh.f32 %v1499_v22  ;;  %v4164_v22 = vld [vmem:[#allocation10 + $0xac] ss:$16 sps:$4 sm:$0xff]   ;;  %v4168_v25 = vld [vmem:[#allocation10 + $0xa8] ss:$16 sps:$4 sm:$0xff]  }
 0x30e   : > { %3512 = vtanh.f32 %v1502_v28  ;;  %v4178_v28 = vld [vmem:[#allocation10 + $0x80] ss:$16 sps:$4 sm:$0xff]  }
 0x317   : > { %v3507_v29 = vpop.eup %3506 }
 0x318   : > { %v1506_v30 = vmul.f32 0.5, %v3507_v29  ;;  %v4180_v29 = vld [vmem:[#allocation10 + $0x88] ss:$16 sps:$4 sm:$0xff]  }
 0x319   : > { %v3509_v31 = vpop.eup %3508 }
 0x31a   : > { %v1509_v32 = vadd.f32 0.5, %v1506_v30  ;;  %v1507_v33 = vmul.f32 0.5, %v3509_v31  ;;  %v3511_v34 = vpop.eup %3510  ;;  %v4186_v30 = vld [vmem:[#allocation10 + $0x64] ss:$16 sps:$4 sm:$0xff]   ;;  %v4188_v31 = vld [vmem:[#allocation10 + $0x6c] ss:$16 sps:$4 sm:$0xff]  }
 0x31b   : > { %v3513_v40 = vpop.eup %3512 }
 0x31c   : > { %v1510_v35 = vadd.f32 0.5, %v1507_v33  ;;  %v1514_v36 = vmul.f32 %v3511_v34, %v1509_v32  ;;  %v1508_v4 = vmul.f32 0.5, %v3513_v40  ;;  %v4190_v32 = vld [vmem:[#allocation10 + $0x60] ss:$16 sps:$4 sm:$0xff]   ;;  %v4192_v33 = vld [vmem:[#allocation10 + $0x68] ss:$16 sps:$4 sm:$0xff]  }
 0x31d   : > { %v4194_v34 = vld [vmem:[#allocation10 + $0x44] ss:$16 sps:$4 sm:$0xff]  }
 0x31e   : > { %v1513_v37 = vmul.f32 %v1510_v35, %v4081_v5  ;;  %v1511_v39 = vadd.f32 0.5, %v1508_v4  ;;  %v3425_v5 = vld [vmem:[#allocation8 + $0x4c] ss:$16 sps:$4 sm:$0xff]   ;;  %v4210_v40 = vld [vmem:[#allocation10 + $0x24] ss:$16 sps:$4 sm:$0xff]  }
 0x31f   : > { %v4196_v35 = vld [vmem:[#allocation10 + $0x4c] ss:$16 sps:$4 sm:$0xff]  }
 0x320   : > { %v4125_v38 = vadd.f32 %v1514_v36, %v1513_v37  ;;  %v4202_v36 = vld [vmem:[#allocation10 + $0x40] ss:$16 sps:$4 sm:$0xff]   ;;  %v4204_v37 = vld [vmem:[#allocation10 + $0x48] ss:$16 sps:$4 sm:$0xff]   ;;  %v4212_v4 = vld [vmem:[#allocation10 + $0x2c] ss:$16 sps:$4 sm:$0xff]  }
 0x322   : > { %3514 = vtanh.f32 %v4125_v38 }
 0x32f   : > { %v3515_v41 = vpop.eup %3514 }
 0x330   : > { %v4128_v61 = vmul.f32 %v3515_v41, %v1511_v39  ;;  %v4214_v39 = vld [vmem:[#allocation10 + $0x20] ss:$16 sps:$4 sm:$0xff]   ;;  %v4216_v41 = vld [vmem:[#allocation10 + $0x28] ss:$16 sps:$4 sm:$0xff]  }
 0x332   : > { %v1527_v54 = vpack.c.bf16 %v4128_v61, %v4128_v61 }
 0x334   : > { %1753 = vmatmul.mubr.bf16.vlgmr.msra.gmra.mxu0 %v1527_v54  ;;  %1794 = vmatmul.mubr.bf16.vlgmr.msra.gmra.mxu1 %v1527_v54  ;;  %v4226_v54 = vld [vmem:[#allocation10] ss:$16 sps:$4 sm:$0xff]  }
 0x335   : > { %2049 = vmatpush1.bf16.msra.mxu0 %v3390_v62  ;;  %2102 = vmatpush1.bf16.msra.mxu1 %v3393_v48  ;;  %v4218_v62 = vld [vmem:[#allocation10 + $0x4] ss:$16 sps:$4 sm:$0xff]   ;;  %v4220_v48 = vld [vmem:[#allocation10 + $0xc] ss:$16 sps:$4 sm:$0xff]  }
 0x336   : > { %2050 = vmatprep.subr.bf16.mxu0 %v3398_v52  ;;  %2103 = vmatprep.subr.bf16.mxu1 %v3401_v46  ;;  %v4228_v52 = vld [vmem:[#allocation10 + $0x8] ss:$16 sps:$4 sm:$0xff]  }
 0x337   : > { %2080 = vmatprep.mubr.bf16.mxu0 %v4491_v6  ;;  %2133 = vmatprep.mubr.bf16.mxu1 %v4491_v6 }
 0x339   : > { %2051 = vmatpush1.bf16.msra.mxu0 %v3396_v58  ;;  %2104 = vmatpush1.bf16.msra.mxu1 %v3399_v2  ;;  %v4494_v2 = vld [vmem:[#allocation16_spill] sm:$0xff] }
 0x33a   : > { %2052 = vmatprep.subr.bf16.mxu0 %v3404_v3  ;;  %2105 = vmatprep.subr.bf16.mxu1 %v3407_v45 }
 0x33d   : > { %2053 = vmatpush1.bf16.msra.mxu0 %v3402_v8  ;;  %2106 = vmatpush1.bf16.msra.mxu1 %v3405_v10 }
 0x33e   : > { %2054 = vmatprep.subr.bf16.mxu0 %v3410_v51  ;;  %2107 = vmatprep.subr.bf16.mxu1 %v3413_v59  ;;  %v4495_v51 = vld [vmem:[#allocation18_spill] sm:$0xff] }
 0x341   : > { %2055 = vmatpush1.bf16.msra.mxu0 %v3408_v53  ;;  %2108 = vmatpush1.bf16.msra.mxu1 %v3411_v55 }
 0x342   : > { %2056 = vmatprep.subr.bf16.mxu0 %v3416_v43  ;;  %2109 = vmatprep.subr.bf16.mxu1 %v3419_v63 }
 0x345   : > { %2057 = vmatpush1.bf16.msra.mxu0 %v3414_v44  ;;  %2110 = vmatpush1.bf16.msra.mxu1 %v3417_v49 }
 0x346   : > { %2058 = vmatprep.subr.bf16.mxu0 %v3422_v50  ;;  %2111 = vmatprep.subr.bf16.mxu1 %v3425_v5  ;;  %v4496_v50 = vld [vmem:[#allocation17_spill] sm:$0xff] }
 0x349   : > { %2059 = vmatpush1.bf16.msra.mxu0 %v3420_v0  ;;  %2112 = vmatpush1.bf16.msra.mxu1 %v3423_v57 }
 0x34a   : > { %2060 = vmatprep.subr.bf16.mxu0 %v3428_v24  ;;  %2113 = vmatprep.subr.bf16.mxu1 %v3431_v60 }
 0x34d   : > { %2061 = vmatpush1.bf16.msra.mxu0 %v3426_v47  ;;  %2114 = vmatpush1.bf16.msra.mxu1 %v3429_v7 }
 0x34e   : > { %2062 = vmatprep.subr.bf16.mxu0 %v3434_v9  ;;  %2115 = vmatprep.subr.bf16.mxu1 %v3437_v11 }
 0x351   : > { %2063 = vmatpush1.bf16.msra.mxu0 %v3432_v12  ;;  %2116 = vmatpush1.bf16.msra.mxu1 %v3435_v13 }
 0x352   : > { %2371 = vmatprep.subr.bf16.mxu0 %v4138_v15  ;;  %2412 = vmatprep.subr.bf16.mxu1 %v4140_v16 }
 0x354   : > { %2081 = vmatmul.mubr.bf16.vlgmr.msra.gmra.mxu0 %v1832_v14  ;;  %2134 = vmatmul.mubr.bf16.vlgmr.msra.gmra.mxu1 %v1832_v14 }
 0x355   : > { %2090 = vmatprep.mubr.bf16.mxu0 %v4491_v6  ;;  %2143 = vmatprep.mubr.bf16.mxu1 %v4491_v6 }
 0x356   : > { %2372 = vmatpush1.bf16.msra.mxu0 %v4142_v17  ;;  %2413 = vmatpush1.bf16.msra.mxu1 %v4144_v18 }
 0x357   : > { %2373 = vmatprep.subr.bf16.mxu0 %v4150_v56  ;;  %2414 = vmatprep.subr.bf16.mxu1 %v4152_v42 }
 0x35a   : > { %2374 = vmatpush1.bf16.msra.mxu0 %v4154_v19  ;;  %2415 = vmatpush1.bf16.msra.mxu1 %v4156_v20 }
 0x35b   : > { %2375 = vmatprep.subr.bf16.mxu0 %v4162_v21  ;;  %2416 = vmatprep.subr.bf16.mxu1 %v4164_v22 }
 0x35e   : > { %2376 = vmatpush1.bf16.msra.mxu0 %v4166_v23  ;;  %2417 = vmatpush1.bf16.msra.mxu1 %v4168_v25 }
 0x35f   : > { %2377 = vmatprep.subr.bf16.mxu0 %v4174_v26  ;;  %2418 = vmatprep.subr.bf16.mxu1 %v4176_v27 }
 0x362   : > { %2378 = vmatpush1.bf16.msra.mxu0 %v4178_v28  ;;  %2419 = vmatpush1.bf16.msra.mxu1 %v4180_v29 }
 0x363   : > { %2379 = vmatprep.subr.bf16.mxu0 %v4186_v30  ;;  %2420 = vmatprep.subr.bf16.mxu1 %v4188_v31 }
 0x366   : > { %2380 = vmatpush1.bf16.msra.mxu0 %v4190_v32  ;;  %2421 = vmatpush1.bf16.msra.mxu1 %v4192_v33 }
 0x367   : > { %2381 = vmatprep.subr.bf16.mxu0 %v4194_v34  ;;  %2422 = vmatprep.subr.bf16.mxu1 %v4196_v35 }
 0x36a   : > { %2382 = vmatpush1.bf16.msra.mxu0 %v4202_v36  ;;  %2423 = vmatpush1.bf16.msra.mxu1 %v4204_v37 }
 0x36b   : > { %2383 = vmatprep.subr.bf16.mxu0 %v4210_v40  ;;  %2424 = vmatprep.subr.bf16.mxu1 %v4212_v4 }
 0x36e   : > { %2384 = vmatpush1.bf16.msra.mxu0 %v4214_v39  ;;  %2425 = vmatpush1.bf16.msra.mxu1 %v4216_v41 }
 0x36f   : > { %2385 = vmatprep.subr.bf16.mxu0 %v4218_v62  ;;  %2426 = vmatprep.subr.bf16.mxu1 %v4220_v48 }
 0x372   : > { %2386 = vmatpush1.bf16.msra.mxu0 %v4226_v54  ;;  %2427 = vmatpush1.bf16.msra.mxu1 %v4228_v52 }
 0x373   : > { %2480 = vmatprep.subr.bf16.mxu0 %v4138_v15  ;;  %2521 = vmatprep.subr.bf16.mxu1 %v4140_v16 }
 0x3f4   : > { %v1754_v46 = vpop.f32.mrf.mxu0  ;;  %v1795_v58 = vpop.f32.mrf.mxu1 }
 0x3f5   : > { %v1802_v3 = vadd.f32 %v1754_v46, %v4494_v2  ;;  %v1804_v5 = vadd.f32 %v1795_v58, %v4496_v50 }
 0x3f6   : > { %v1756_v45 = vpop.f32.mrf.mxu0  ;;  %v1797_v8 = vpop.f32.mrf.mxu1 }
 0x3f7   : > { %v1806_v10 = vmul.f32 0.5, %v1802_v3  ;;  %v1803_v59 = vadd.f32 %v1756_v45, %v4495_v51  ;;  %v1805_v63 = vadd.f32 %v1797_v8, %v4033_v1  ;;  %v1808_v0 = vmul.f32 0.5, %v1804_v5  ;;  %v2171_v8 = vld [vmem:[#allocation2 + $0x8] sm:$0xff] }
 0x3f8   : > { %v1758_v53 = vpop.f32.mrf.mxu0  ;;  %v1799_v55 = vpop.f32.mrf.mxu1 }
 0x3f9   : > { %3516 = vtanh.f32 %v1806_v10  ;;  %v1807_v43 = vmul.f32 0.5, %v1803_v59  ;;  %v2178_v10 = vpack.c.bf16 %v2171_v8, %v2171_v8 }
 0x3fa   : > { %v1759_v44 = vpop.f32.mrf.mxu0  ;;  %v1800_v49 = vpop.f32.mrf.mxu1 }
 0x3fb   : > { %3518 = vtanh.f32 %v1807_v43  ;;  %v1866_v44 = vld [vmem:[%s4469_s6] sm:$0xf] }
 0x3fc   : > { %3520 = vtanh.f32 %v1805_v63 }
 0x3fd   : > { %3522 = vtanh.f32 %v1808_v0 }
 0x406   : > { %v3517_v57 = vpop.eup %3516 }
 0x407   : > { %v1812_v24 = vmul.f32 0.5, %v3517_v57  ;;  %v4499_v57 = vld [vmem:[#allocation13_spill] sm:$0xff] }
 0x408   : > { %v3519_v60 = vpop.eup %3518 }
 0x409   : > { %v1815_v47 = vadd.f32 0.5, %v1812_v24  ;;  %v1813_v7 = vmul.f32 0.5, %v3519_v60  ;;  %v3521_v9 = vpop.eup %3520  ;;  %v4500_v24 = vsub.s32 0, %v4499_v57 }
 0x40a   : > { %v3523_v1 = vpop.eup %3522 }
 0x40b   : > { %v1816_v11 = vadd.f32 0.5, %v1813_v7  ;;  %v1820_v12 = vmul.f32 %v3521_v9, %v1815_v47  ;;  %v1814_v46 = vmul.f32 0.5, %v3523_v1  ;;  %v4299_v60 = vrot.slane %v1866_v44, %v4500_v24 }
 0x40c   : > { %v4503_v9 = vsub.s32 1, %v4499_v57 }
 0x40d   : > { %v1819_v13 = vmul.f32 %v1816_v11, %v4125_v38  ;;  %v1817_v2 = vadd.f32 0.5, %v1814_v46 }
 0x40e   : > { %v4307_v11 = vrot.slane %v1866_v44, %v4503_v9 }
 0x40f   : > { %v1821_v14 = vadd.f32 %v1820_v12, %v1819_v13 }
 0x411   : > { %3524 = vtanh.f32 %v1821_v14  ;;  %1827 = vst [vmem:[#allocation3 + $0x8] sm:$0xff] %v1821_v14 }
 0x414   : > { %v2082_v38 = vpop.f32.mrf.mxu0 }
 0x415   : > { %v2083_v14 = vadd.f32 %v2082_v38, %v4299_v60 }
 0x416   : > { %v2084_v51 = vpop.f32.mrf.mxu0 }
 0x418   : > { %v4278_v53 = vpop.f32.mrf.mxu0 }
 0x41a   : > { %v4282_v43 = vpop.f32.mrf.mxu0 }
 0x41e   : > { %v3525_v3 = vpop.eup %3524 }
 0x41f   : > { %v1823_v58 = vmul.f32 %v3525_v3, %v1817_v2  ;;  %v2085_v2 = vadd.f32 %v2084_v51, %v4307_v11  ;;  %v4506_v3 = vsub.s32 3, %v4499_v57 }
 0x421   : > { %1826 = vst [vmem:[#allocation2] sm:$0xff] %v1823_v58  ;;  %v1833_v45 = vpack.c.bf16 %v1823_v58, %v4128_v61  ;;  %v2135_v61 = vpop.f32.mrf.mxu1  ;;  %v4317_v58 = vrot.slane %v1866_v44, %v4506_v3 }
 0x423   : > { %2091 = vmatmul.mubr.bf16.gmra.mxu0 %v1833_v45  ;;  %2144 = vmatmul.mubr.bf16.gmra.mxu1 %v1833_v45  ;;  %v2137_v59 = vpop.f32.mrf.mxu1 }
 0x424   : > { %2403 = vmatprep.mubr.bf16.mxu0 %v4491_v6  ;;  %2444 = vmatprep.mubr.bf16.mxu1 %v4491_v6 }
 0x425   : > { %v4280_v55 = vpop.f32.mrf.mxu1 }
 0x427   : > { %v4284_v63 = vpop.f32.mrf.mxu1 }
 0x42b   : > { %2404 = vmatmul.mubr.bf16.vlgmr.msra.gmra.mxu0 %v2178_v10  ;;  %2445 = vmatmul.mubr.bf16.vlgmr.msra.gmra.mxu1 %v2178_v10 }
 0x42c   : > { %2481 = vmatpush1.bf16.msra.mxu0 %v4142_v17  ;;  %2522 = vmatpush1.bf16.msra.mxu1 %v4144_v18 }
 0x42d   : > { %2482 = vmatprep.subr.bf16.mxu0 %v4150_v56  ;;  %2523 = vmatprep.subr.bf16.mxu1 %v4152_v42 }
 0x42e   : > { %2512 = vmatprep.mubr.bf16.mxu0 %v4491_v6  ;;  %2553 = vmatprep.mubr.bf16.mxu1 %v4491_v6 }
 0x430   : > { %2483 = vmatpush1.bf16.msra.mxu0 %v4154_v19  ;;  %2524 = vmatpush1.bf16.msra.mxu1 %v4156_v20 }
 0x431   : > { %2484 = vmatprep.subr.bf16.mxu0 %v4162_v21  ;;  %2525 = vmatprep.subr.bf16.mxu1 %v4164_v22 }
 0x434   : > { %2485 = vmatpush1.bf16.msra.mxu0 %v4166_v23  ;;  %2526 = vmatpush1.bf16.msra.mxu1 %v4168_v25 }
 0x435   : > { %2486 = vmatprep.subr.bf16.mxu0 %v4174_v26  ;;  %2527 = vmatprep.subr.bf16.mxu1 %v4176_v27 }
 0x438   : > { %2487 = vmatpush1.bf16.msra.mxu0 %v4178_v28  ;;  %2528 = vmatpush1.bf16.msra.mxu1 %v4180_v29 }
 0x439   : > { %2488 = vmatprep.subr.bf16.mxu0 %v4186_v30  ;;  %2529 = vmatprep.subr.bf16.mxu1 %v4188_v31 }
 0x43c   : > { %2489 = vmatpush1.bf16.msra.mxu0 %v4190_v32  ;;  %2530 = vmatpush1.bf16.msra.mxu1 %v4192_v33 }
 0x43d   : > { %2490 = vmatprep.subr.bf16.mxu0 %v4194_v34  ;;  %2531 = vmatprep.subr.bf16.mxu1 %v4196_v35 }
 0x440   : > { %2491 = vmatpush1.bf16.msra.mxu0 %v4202_v36  ;;  %2532 = vmatpush1.bf16.msra.mxu1 %v4204_v37 }
 0x441   : > { %2492 = vmatprep.subr.bf16.mxu0 %v4210_v40  ;;  %2533 = vmatprep.subr.bf16.mxu1 %v4212_v4 }
 0x444   : > { %2493 = vmatpush1.bf16.msra.mxu0 %v4214_v39  ;;  %2534 = vmatpush1.bf16.msra.mxu1 %v4216_v41 }
 0x445   : > { %2494 = vmatprep.subr.bf16.mxu0 %v4218_v62  ;;  %2535 = vmatprep.subr.bf16.mxu1 %v4220_v48 }
 0x448   : > { %2495 = vmatpush1.bf16.msra.mxu0 %v4226_v54  ;;  %2536 = vmatpush1.bf16.msra.mxu1 %v4228_v52 }
 0x449   : > { %2589 = vmatprep.subr.bf16.mxu0 %v4138_v15  ;;  %2630 = vmatprep.subr.bf16.mxu1 %v4140_v16 }
 0x4e3   : > { %v4289_v49 = vpop.f32.mrf.mxu0  ;;  %v4291_v50 = vpop.f32.mrf.mxu1 }
 0x4e4   : > { %4497 = vst [vmem:[#allocation15_spill] sm:$0xff] %v4291_v50 }
 0x4e5   : > { %v4293_v5 = vpop.f32.mrf.mxu0  ;;  %v4295_v0 = vpop.f32.mrf.mxu1 }
 0x4e6   : > { %4498 = vst [vmem:[#allocation14_spill] sm:$0xff] %v4295_v0  ;;  %v4507_v0 = vsub.s32 2, %v4499_v57 }
 0x4e7   : > { %v4301_v47 = vpop.f32.mrf.mxu0  ;;  %v4303_v7 = vpop.f32.mrf.mxu1 }
 0x4e8   : > { %4501 = vst [vmem:[#allocation16_spill] sm:$0xff] %v4301_v47  ;;  %4502 = vst [vmem:[#allocation18_spill] sm:$0xff] %v4303_v7  ;;  %v4322_v51 = vrot.slane %v1866_v44, %v4507_v0 }
 0x4e9   : > { %v4309_v12 = vpop.f32.mrf.mxu0  ;;  %v4311_v13 = vpop.f32.mrf.mxu1 }
 0x4ea   : > { %4504 = vst [vmem:[#allocation17_spill] sm:$0xff] %v4309_v12  ;;  %4505 = vst [vmem:[#allocation13_spill] sm:$0xff] %v4311_v13  ;;  %v2138_v12 = vadd.f32 %v2137_v59, %v4317_v58 }
 0x4eb   : > { %v2405_v1 = vpop.f32.mrf.mxu0  ;;  %v2446_v46 = vpop.f32.mrf.mxu1 }
 0x4ec   : > { %v2453_v45 = vadd.f32 %v2405_v1, %v2083_v14  ;;  %v2136_v14 = vadd.f32 %v2135_v61, %v4322_v51 }
 0x4ed   : > { %v2407_v8 = vpop.f32.mrf.mxu0  ;;  %v2448_v10 = vpop.f32.mrf.mxu1 }
 0x4ee   : > { %v2457_v24 = vmul.f32 0.5, %v2453_v45  ;;  %v2454_v9 = vadd.f32 %v2407_v8, %v2085_v2  ;;  %v2456_v3 = vadd.f32 %v2448_v10, %v2138_v12  ;;  %v2455_v1 = vadd.f32 %v2446_v46, %v2136_v14 }
 0x4ef   : > { %v2409_v7 = vpop.f32.mrf.mxu0  ;;  %v2450_v47 = vpop.f32.mrf.mxu1 }
 0x4f0   : > { %3526 = vtanh.f32 %v2457_v24  ;;  %v2458_v13 = vmul.f32 0.5, %v2454_v9  ;;  %v2459_v45 = vmul.f32 0.5, %v2455_v1  ;;  %v2173_v24 = vld [vmem:[#allocation3] sm:$0xff] }
 0x4f1   : > { %v2410_v38 = vpop.f32.mrf.mxu0  ;;  %v2451_v50 = vpop.f32.mrf.mxu1 }
 0x4f2   : > { %3528 = vtanh.f32 %v2458_v13 }
 0x4f3   : > { %3530 = vtanh.f32 %v2456_v3  ;;  %v2087_v3 = vadd.f32 %v4278_v53, %v4299_v60 }
 0x4f4   : > { %3532 = vtanh.f32 %v2459_v45  ;;  %v2089_v45 = vadd.f32 %v4282_v43, %v4307_v11 }
 0x4fd   : > { %v3527_v2 = vpop.eup %3526 }
 0x4fe   : > { %v2463_v7 = vmul.f32 0.5, %v3527_v2 }
 0x4ff   : > { %v3529_v47 = vpop.eup %3528 }
 0x500   : > { %v2466_v8 = vadd.f32 0.5, %v2463_v7  ;;  %v2464_v59 = vmul.f32 0.5, %v3529_v47  ;;  %v3531_v50 = vpop.eup %3530 }
 0x501   : > { %v3533_v0 = vpop.eup %3532 }
 0x502   : > { %v2467_v9 = vadd.f32 0.5, %v2464_v59  ;;  %v2471_v57 = vmul.f32 %v3531_v50, %v2466_v8  ;;  %v2465_v61 = vmul.f32 0.5, %v3533_v0 }
 0x504   : > { %v2470_v38 = vmul.f32 %v2467_v9, %v2173_v24  ;;  %v2468_v12 = vadd.f32 0.5, %v2465_v61 }
 0x506   : > { %v4325_v44 = vadd.f32 %v2471_v57, %v2470_v38  ;;  %v2140_v57 = vadd.f32 %v4280_v55, %v4322_v51 }
 0x508   : > { %3534 = vtanh.f32 %v4325_v44 }
 0x515   : > { %v3535_v13 = vpop.eup %3534 }
 0x516   : > { %v2474_v46 = vmul.f32 %v3535_v13, %v2468_v12 }
 0x518   : > { %v2479_v10 = vpack.c.bf16 %v2474_v46, %v2474_v46 }
 0x51a   : > { %2513 = vmatmul.mubr.bf16.vlgmr.msra.gmra.mxu0 %v2479_v10  ;;  %2554 = vmatmul.mubr.bf16.vlgmr.msra.gmra.mxu1 %v2479_v10 }
 0x51b   : > { %2590 = vmatpush1.bf16.msra.mxu0 %v4142_v17  ;;  %2631 = vmatpush1.bf16.msra.mxu1 %v4144_v18 }
 0x51c   : > { %2591 = vmatprep.subr.bf16.mxu0 %v4150_v56  ;;  %2632 = vmatprep.subr.bf16.mxu1 %v4152_v42 }
 0x51d   : > { %2621 = vmatprep.mubr.bf16.mxu0 %v4491_v6  ;;  %2662 = vmatprep.mubr.bf16.mxu1 %v4491_v6 }
 0x51f   : > { %2592 = vmatpush1.bf16.msra.mxu0 %v4154_v19  ;;  %2633 = vmatpush1.bf16.msra.mxu1 %v4156_v20 }
 0x520   : > { %2593 = vmatprep.subr.bf16.mxu0 %v4162_v21  ;;  %2634 = vmatprep.subr.bf16.mxu1 %v4164_v22 }
 0x523   : > { %2594 = vmatpush1.bf16.msra.mxu0 %v4166_v23  ;;  %2635 = vmatpush1.bf16.msra.mxu1 %v4168_v25 }
 0x524   : > { %2595 = vmatprep.subr.bf16.mxu0 %v4174_v26  ;;  %2636 = vmatprep.subr.bf16.mxu1 %v4176_v27 }
 0x527   : > { %2596 = vmatpush1.bf16.msra.mxu0 %v4178_v28  ;;  %2637 = vmatpush1.bf16.msra.mxu1 %v4180_v29 }
 0x528   : > { %2597 = vmatprep.subr.bf16.mxu0 %v4186_v30  ;;  %2638 = vmatprep.subr.bf16.mxu1 %v4188_v31 }
 0x52b   : > { %2598 = vmatpush1.bf16.msra.mxu0 %v4190_v32  ;;  %2639 = vmatpush1.bf16.msra.mxu1 %v4192_v33 }
 0x52c   : > { %2599 = vmatprep.subr.bf16.mxu0 %v4194_v34  ;;  %2640 = vmatprep.subr.bf16.mxu1 %v4196_v35 }
 0x52f   : > { %2600 = vmatpush1.bf16.msra.mxu0 %v4202_v36  ;;  %2641 = vmatpush1.bf16.msra.mxu1 %v4204_v37 }
 0x530   : > { %2601 = vmatprep.subr.bf16.mxu0 %v4210_v40  ;;  %2642 = vmatprep.subr.bf16.mxu1 %v4212_v4 }
 0x533   : > { %2602 = vmatpush1.bf16.msra.mxu0 %v4214_v39  ;;  %2643 = vmatpush1.bf16.msra.mxu1 %v4216_v41 }
 0x534   : > { %2603 = vmatprep.subr.bf16.mxu0 %v4218_v62  ;;  %2644 = vmatprep.subr.bf16.mxu1 %v4220_v48 }
 0x537   : > { %2604 = vmatpush1.bf16.msra.mxu0 %v4226_v54  ;;  %2645 = vmatpush1.bf16.msra.mxu1 %v4228_v52 }
 0x538   : > { %2698 = vmatprep.subr.bf16.mxu0 %v4138_v15  ;;  %2739 = vmatprep.subr.bf16.mxu1 %v4140_v16  ;;  %v2142_v15 = vadd.f32 %v4284_v63, %v4317_v58 }
 0x5da   : > { %v2514_v14 = vpop.f32.mrf.mxu0  ;;  %v2555_v1 = vpop.f32.mrf.mxu1 }
 0x5db   : > { %v2562_v2 = vadd.f32 %v2514_v14, %v2087_v3  ;;  %v2564_v43 = vadd.f32 %v2555_v1, %v2140_v57  ;;  %v4511_v57 = vld [vmem:[#allocation17_spill] sm:$0xff] }
 0x5dc   : > { %v2516_v7 = vpop.f32.mrf.mxu0  ;;  %v2557_v47 = vpop.f32.mrf.mxu1 }
 0x5dd   : > { %v2566_v8 = vmul.f32 0.5, %v2562_v2  ;;  %v2563_v59 = vadd.f32 %v2516_v7, %v2089_v45  ;;  %v2565_v53 = vadd.f32 %v2557_v47, %v2142_v15  ;;  %v2568_v0 = vmul.f32 0.5, %v2564_v43 }
 0x5de   : > { %v2518_v24 = vpop.f32.mrf.mxu0  ;;  %v2559_v9 = vpop.f32.mrf.mxu1  ;;  %v2099_v43 = vadd.f32 %v4511_v57, %v4307_v11 }
 0x5df   : > { %3536 = vtanh.f32 %v2566_v8  ;;  %v2567_v16 = vmul.f32 0.5, %v2563_v59 }
 0x5e0   : > { %v2519_v50 = vpop.f32.mrf.mxu0  ;;  %v2560_v38 = vpop.f32.mrf.mxu1 }
 0x5e1   : > { %3538 = vtanh.f32 %v2567_v16  ;;  %v4510_v16 = vld [vmem:[#allocation16_spill] sm:$0xff] }
 0x5e2   : > { %3540 = vtanh.f32 %v2565_v53  ;;  %v2097_v50 = vadd.f32 %v4510_v16, %v4299_v60 }
 0x5e3   : > { %3542 = vtanh.f32 %v2568_v0 }
 0x5ec   : > { %v3537_v61 = vpop.eup %3536 }
 0x5ed   : > { %v2572_v12 = vmul.f32 0.5, %v3537_v61 }
 0x5ee   : > { %v3539_v13 = vpop.eup %3538 }
 0x5ef   : > { %v2575_v46 = vadd.f32 0.5, %v2572_v12  ;;  %v2573_v10 = vmul.f32 0.5, %v3539_v13  ;;  %v3541_v63 = vpop.eup %3540  ;;  %v4512_v13 = vld [vmem:[#allocation13_spill] sm:$0xff] }
 0x5f0   : > { %v3543_v7 = vpop.eup %3542 }
 0x5f1   : > { %v2576_v3 = vadd.f32 0.5, %v2573_v10  ;;  %v2580_v45 = vmul.f32 %v3541_v63, %v2575_v46  ;;  %v2574_v55 = vmul.f32 0.5, %v3543_v7  ;;  %v2152_v46 = vadd.f32 %v4512_v13, %v4317_v58 }
 0x5f3   : > { %v2579_v14 = vmul.f32 %v2576_v3, %v4325_v44  ;;  %v2577_v47 = vadd.f32 0.5, %v2574_v55  ;;  %v4513_v55 = vld [vmem:[#allocation18_spill] sm:$0xff] }
 0x5f5   : > { %v4371_v2 = vadd.f32 %v2580_v45, %v2579_v14 }
 0x5f7   : > { %3544 = vtanh.f32 %v4371_v2 }
 0x604   : > { %v3545_v1 = vpop.eup %3544 }
 0x605   : > { %v2583_v8 = vmul.f32 %v3545_v1, %v2577_v47 }
 0x607   : > { %v2588_v59 = vpack.c.bf16 %v2583_v8, %v2583_v8 }
 0x609   : > { %2622 = vmatmul.mubr.bf16.vlgmr.msra.gmra.mxu0 %v2588_v59  ;;  %2663 = vmatmul.mubr.bf16.vlgmr.msra.gmra.mxu1 %v2588_v59 }
 0x60a   : > { %2699 = vmatpush1.bf16.msra.mxu0 %v4142_v17  ;;  %2740 = vmatpush1.bf16.msra.mxu1 %v4144_v18 }
 0x60b   : > { %2700 = vmatprep.subr.bf16.mxu0 %v4150_v56  ;;  %2741 = vmatprep.subr.bf16.mxu1 %v4152_v42  ;;  %v2095_v56 = vadd.f32 %v4293_v5, %v4307_v11  ;;  %v2150_v11 = vadd.f32 %v4513_v55, %v4322_v51 }
 0x60c   : > { %2730 = vmatprep.mubr.bf16.mxu0 %v4491_v6  ;;  %2771 = vmatprep.mubr.bf16.mxu1 %v4491_v6  ;;  %v2093_v6 = vadd.f32 %v4289_v49, %v4299_v60 }
 0x60e   : > { %2701 = vmatpush1.bf16.msra.mxu0 %v4154_v19  ;;  %2742 = vmatpush1.bf16.msra.mxu1 %v4156_v20 }
 0x60f   : > { %2702 = vmatprep.subr.bf16.mxu0 %v4162_v21  ;;  %2743 = vmatprep.subr.bf16.mxu1 %v4164_v22  ;;  %v4508_v21 = vld [vmem:[#allocation14_spill] sm:$0xff] }
 0x610   : > { %v2148_v22 = vadd.f32 %v4508_v21, %v4317_v58 }
 0x612   : > { %2703 = vmatpush1.bf16.msra.mxu0 %v4166_v23  ;;  %2744 = vmatpush1.bf16.msra.mxu1 %v4168_v25 }
 0x613   : > { %2704 = vmatprep.subr.bf16.mxu0 %v4174_v26  ;;  %2745 = vmatprep.subr.bf16.mxu1 %v4176_v27 }
 0x616   : > { %2705 = vmatpush1.bf16.msra.mxu0 %v4178_v28  ;;  %2746 = vmatpush1.bf16.msra.mxu1 %v4180_v29 }
 0x617   : > { %2706 = vmatprep.subr.bf16.mxu0 %v4186_v30  ;;  %2747 = vmatprep.subr.bf16.mxu1 %v4188_v31 }
 0x61a   : > { %2707 = vmatpush1.bf16.msra.mxu0 %v4190_v32  ;;  %2748 = vmatpush1.bf16.msra.mxu1 %v4192_v33  ;;  %v4509_v32 = vld [vmem:[#allocation15_spill] sm:$0xff] }
 0x61b   : > { %2708 = vmatprep.subr.bf16.mxu0 %v4194_v34  ;;  %2749 = vmatprep.subr.bf16.mxu1 %v4196_v35  ;;  %v2146_v33 = vadd.f32 %v4509_v32, %v4322_v51 }
 0x61e   : > { %2709 = vmatpush1.bf16.msra.mxu0 %v4202_v36  ;;  %2750 = vmatpush1.bf16.msra.mxu1 %v4204_v37 }
 0x61f   : > { %2710 = vmatprep.subr.bf16.mxu0 %v4210_v40  ;;  %2751 = vmatprep.subr.bf16.mxu1 %v4212_v4 }
 0x622   : > { %2711 = vmatpush1.bf16.msra.mxu0 %v4214_v39  ;;  %2752 = vmatpush1.bf16.msra.mxu1 %v4216_v41 }
 0x623   : > { %2712 = vmatprep.subr.bf16.mxu0 %v4218_v62  ;;  %2753 = vmatprep.subr.bf16.mxu1 %v4220_v48 }
 0x626   : > { %2713 = vmatpush1.bf16.msra.mxu0 %v4226_v54  ;;  %2754 = vmatpush1.bf16.msra.mxu1 %v4228_v52 }
 0x6c9   : > { %v2623_v17 = vpop.f32.mrf.mxu0  ;;  %v2664_v18 = vpop.f32.mrf.mxu1 }
 0x6ca   : > { %v2671_v42 = vadd.f32 %v2623_v17, %v2093_v6  ;;  %v2673_v34 = vadd.f32 %v2664_v18, %v2146_v33 }
 0x6cb   : > { %v2625_v19 = vpop.f32.mrf.mxu0  ;;  %v2666_v20 = vpop.f32.mrf.mxu1 }
 0x6cc   : > { %v2675_v23 = vmul.f32 0.5, %v2671_v42  ;;  %v2672_v25 = vadd.f32 %v2625_v19, %v2095_v56  ;;  %v2674_v29 = vadd.f32 %v2666_v20, %v2148_v22  ;;  %v2677_v35 = vmul.f32 0.5, %v2673_v34 }
 0x6cd   : > { %v2627_v26 = vpop.f32.mrf.mxu0  ;;  %v2668_v27 = vpop.f32.mrf.mxu1 }
 0x6ce   : > { %3546 = vtanh.f32 %v2675_v23  ;;  %v2676_v28 = vmul.f32 0.5, %v2672_v25 }
 0x6cf   : > { %v2628_v30 = vpop.f32.mrf.mxu0  ;;  %v2669_v31 = vpop.f32.mrf.mxu1 }
 0x6d0   : > { %3548 = vtanh.f32 %v2676_v28 }
 0x6d1   : > { %3550 = vtanh.f32 %v2674_v29 }
 0x6d2   : > { %3552 = vtanh.f32 %v2677_v35 }
 0x6db   : > { %v3547_v36 = vpop.eup %3546 }
 0x6dc   : > { %v2681_v37 = vmul.f32 0.5, %v3547_v36 }
 0x6dd   : > { %v3549_v40 = vpop.eup %3548 }
 0x6de   : > { %v2684_v4 = vadd.f32 0.5, %v2681_v37  ;;  %v2682_v39 = vmul.f32 0.5, %v3549_v40  ;;  %v3551_v41 = vpop.eup %3550 }
 0x6df   : > { %v3553_v49 = vpop.eup %3552 }
 0x6e0   : > { %v2685_v62 = vadd.f32 0.5, %v2682_v39  ;;  %v2689_v48 = vmul.f32 %v3551_v41, %v2684_v4  ;;  %v2683_v5 = vmul.f32 0.5, %v3553_v49 }
 0x6e2   : > { %v2688_v54 = vmul.f32 %v2685_v62, %v4371_v2  ;;  %v2686_v44 = vadd.f32 0.5, %v2683_v5 }
 0x6e4   : > { %v2690_v52 = vadd.f32 %v2689_v48, %v2688_v54 }
 0x6e6   : > { %3554 = vtanh.f32 %v2690_v52 }
 0x6f3   : > { %v3555_v24 = vpop.eup %3554 }
 0x6f4   : > { %v2692_v9 = vmul.f32 %v3555_v24, %v2686_v44 }
 0x6f6   : > { %v2697_v15 = vpack.c.bf16 %v2692_v9, %v2692_v9 }
 0x6f8   : > { %2731 = vmatmul.mubr.bf16.vlgmr.msra.gmra.mxu0 %v2697_v15  ;;  %2772 = vmatmul.mubr.bf16.vlgmr.msra.gmra.mxu1 %v2697_v15 }
 0x7b8   : > { %v2732_v38 = vpop.f32.mrf.mxu0  ;;  %v2773_v53 = vpop.f32.mrf.mxu1 }
 0x7b9   : > { %v2780_v0 = vadd.f32 %v2732_v38, %v2097_v50  ;;  %v2782_v47 = vadd.f32 %v2773_v53, %v2150_v11 }
 0x7ba   : > { %v2734_v61 = vpop.f32.mrf.mxu0  ;;  %v2775_v12 = vpop.f32.mrf.mxu1 }
 0x7bb   : > { %v2784_v10 = vmul.f32 0.5, %v2780_v0  ;;  %v2781_v3 = vadd.f32 %v2734_v61, %v2099_v43  ;;  %v2783_v2 = vadd.f32 %v2775_v12, %v2152_v46  ;;  %v2786_v1 = vmul.f32 0.5, %v2782_v47 }
 0x7bc   : > { %v2736_v63 = vpop.f32.mrf.mxu0  ;;  %v2777_v14 = vpop.f32.mrf.mxu1 }
 0x7bd   : > { %3556 = vtanh.f32 %v2784_v10  ;;  %v2785_v45 = vmul.f32 0.5, %v2781_v3 }
 0x7be   : > { %v2737_v7 = vpop.f32.mrf.mxu0  ;;  %v2778_v60 = vpop.f32.mrf.mxu1 }
 0x7bf   : > { %3558 = vtanh.f32 %v2785_v45 }
 0x7c0   : > { %3560 = vtanh.f32 %v2783_v2 }
 0x7c1   : > { %3562 = vtanh.f32 %v2786_v1 }
 0x7ca   : > { %v3557_v8 = vpop.eup %3556 }
 0x7cb   : > { %v2790_v59 = vmul.f32 0.5, %v3557_v8 }
 0x7cc   : > { %v3559_v6 = vpop.eup %3558 }
 0x7cd   : > { %v2793_v58 = vadd.f32 0.5, %v2790_v59  ;;  %v2791_v17 = vmul.f32 0.5, %v3559_v6  ;;  %v3561_v18 = vpop.eup %3560 }
 0x7ce   : > { %v3563_v21 = vpop.eup %3562 }
 0x7cf   : > { %v2794_v56 = vadd.f32 0.5, %v2791_v17  ;;  %v2798_v42 = vmul.f32 %v3561_v18, %v2793_v58  ;;  %v2792_v22 = vmul.f32 0.5, %v3563_v21 }
 0x7d1   : > { %v2797_v19 = vmul.f32 %v2794_v56, %v2690_v52  ;;  %v2795_v23 = vadd.f32 0.5, %v2792_v22 }
 0x7d3   : > { %v2799_v20 = vadd.f32 %v2798_v42, %v2797_v19 }
 0x7d5   : > { %3564 = vtanh.f32 %v2799_v20  ;;  %2803 = vst [vmem:[#allocation3] sm:$0xff] %v2799_v20 }
 0x7e1   : > { %2807 = sbr.rel (%p3231_p2) target bundleno = 2254 (0x8ce), region = 76 }
 0x7e2   : > { %v3565_v25 = vpop.eup %3564 }
 0x7e3   : > { %v2801_v51 = vmul.f32 %v3565_v25, %v2795_v23 }
 0x7e5   : > { %2802 = vst [vmem:[#allocation2 + $0x8] sm:$0xff] %v2801_v51 }
 0x7e6   : > { %v3566_v26 = vld [vmem:[%s4470_s7 + $0x38] sm:$0xff]   ;;  %v3691_v27 = vmov 0.0   ;;  %v3567_v28 = vld [vmem:[%s4470_s7 + $0x30] sm:$0xff]   ;;  %vm3692_vm1 = vmmov 0   ;;  %v3568_v29 = vld [vmem:[%s4470_s7 + $0x28] sm:$0xff]   ;;  %vm2921_vm2 = vcmask 31744  }
 0x7e7   : > { %3253 = vmatprep.subr.bf16.mxu0 %v3691_v27  ;;  %3269 = vmatprep.mubr.msk.bf16.mxu0 %vm3692_vm1, %v3691_v27  ;;  %v3569_v30 = vld [vmem:[%s4470_s7 + $0x20] sm:$0xff]   ;;  %v3570_v31 = vld [vmem:[%s4470_s7 + $0x18] sm:$0xff]   ;;  %v3571_v32 = vld [vmem:[%s4470_s7 + $0x10] sm:$0xff]  }
 0x7e8   : > { %3254 = vmatpush3.bf16.msra.mxu0 %v3566_v26  ;;  %v3572_v33 = vld [vmem:[%s4470_s7 + $0x8] sm:$0xff]   ;;  %v3573_v34 = vld [vmem:[%s4470_s7] sm:$0xff]  }
 0x7e9   : > { %3255 = vmatprep.subr.bf16.mxu0 %v3691_v27  ;;  %v3232_v37 = vld [vmem:[%s4471_s8] ss:$0 sm:$0xff] }
 0x7ec   : > { %3256 = vmatpush3.bf16.msra.mxu0 %v3567_v28  ;;  %v2808_v35 = vld [vmem:[#allocation2 + $0x8] sm:$0xff] }
 0x7ed   : > { %3257 = vmatprep.subr.bf16.mxu0 %v3691_v27  ;;  %v2809_v36 = vpack.c.bf16 %v2808_v35, %v2808_v35 }
 0x7f0   : > { %3258 = vmatpush3.bf16.msra.mxu0 %v3568_v29 }
 0x7f1   : > { %3259 = vmatprep.subr.bf16.mxu0 %v3691_v27 }
 0x7f4   : > { %3260 = vmatpush3.bf16.msra.mxu0 %v3569_v30 }
 0x7f5   : > { %3261 = vmatprep.subr.bf16.mxu0 %v3691_v27 }
 0x7f8   : > { %3262 = vmatpush3.bf16.msra.mxu0 %v3570_v31 }
 0x7f9   : > { %3263 = vmatprep.subr.bf16.mxu0 %v3691_v27 }
 0x7fc   : > { %3264 = vmatpush3.bf16.msra.mxu0 %v3571_v32 }
 0x7fd   : > { %3265 = vmatprep.subr.bf16.mxu0 %v3691_v27 }
 0x800   : > { %3266 = vmatpush3.bf16.msra.mxu0 %v3572_v33 }
 0x801   : > { %3267 = vmatprep.subr.bf16.mxu0 %v3691_v27 }
 0x804   : > { %3268 = vmatpush3.bf16.msra.mxu0 %v3573_v34 }
 0x807   : > { %3270 = vmatmul.mubr.bf16.vlgmr.msra.gmra.mxu0 %v2809_v36 }
 0x8c7   : > { %v2915_v40 = vpop.f32.mrf.mxu0 }
 0x8c8   : > { %v2916_v4 = vadd.f32 %v3232_v37, %v2915_v40 }
 0x8c9   : > { %v3271_v39 = vpop.f32.mrf.mxu0 }
 0x8ca   : > { %2922 = vst.msk [vmem:[%s4472_s9] sm:$0xff] %vm2921_vm2, %v2916_v4 }
 0x8cb   : > { %v2918_v41 = vpop.f32.mrf.mxu0 }
 0x8cd   : > { %v3272_v62 = vpop.f32.mrf.mxu0 }
 0x8ce PF: > { %s21_s11 = sadd.s32 1, %s3682_s11   ;;  %s4514_s30 = smov %s3678_s10 }
 0x8cf   : > { %p18_p5 = scmp.ge.s32.totalorder %s21_s11, 4   ;;  %s4515_s10 = smov %s4517_s18 }
 0x8d1   :  { %20 = sbr.rel (!%p18_p5) target bundleno = 3 (0x3), region = 116 }
 0x8d6   :  { %2942 = vsyncpa [#allocation7], 1 }
 0x8d7   :  { %2944 = vsyncpa [#allocation7 + $0x1], 1 }
 0x8d8   :  { %2945 = vsyncpa [#allocation9], 1 }

</bundles_post_ra>
